<compile_context>
chip_gen: v7x
topology: tpu7x:2x2x1
jax: 0.10.0
libtpu: 0.0.40
codegen_flags: <defaults>
</compile_context>

<pallas_src>
import functools

import jax
import jax.numpy as jnp
from jax import lax
from jax.experimental import pallas as pl
from jax.experimental.pallas import tpu as pltpu

SIGMA_Z = 1.0  # kernel_z_opts = {"sigma": 1.0}


def _hsic_tile_kernel(zi_ref, zj_ref, sqi_ref, sqj_ref, li_ref, lj_ref,
                      acc_ref, *, strips):
    i = pl.program_id(1)  # reduction axis (row blocks of K_z)

    @pl.when(i == 0)
    def _init():
        acc_ref[...] = jnp.zeros_like(acc_ref)

    # <z_i, z_j> / sigma^2: contract the last axis of BOTH operands so z.T is
    # never materialized (the transpose folds into the MXU pass).  This is the
    # only tile-sized intermediate in the kernel.
    zz = lax.dot_general(zi_ref[...], zj_ref[...], (((1,), (1,)), ((), ())),
                         preferred_element_type=jnp.float32)      # (ti, tj)
    tj = zz.shape[1]

    # Hoist the (1, tj) -> (8, tj) broadcasts out of the strip loop (JAX does
    # not CSE broadcast_in_dim).
    sqj = jnp.broadcast_to(sqj_ref[...], (8, tj))   # -||z_j||^2 / (2 sigma^2)
    lj = jnp.broadcast_to(lj_ref[...], (8, tj))     # int32 labels

    acc_kz = jnp.zeros((8, tj), jnp.float32)
    acc_kz2 = jnp.zeros((8, tj), jnp.float32)
    acc_msk = jnp.zeros((8, tj), jnp.float32)

    # Strip-wise accumulation: each 8-row kz strip and its products live
    # entirely in vregs (pure VALU/EUP work, no full-tile VMEM spills).
    for k in range(strips):
        sl = slice(8 * k, 8 * (k + 1))
        e = sqi_ref[sl, :] + sqj + zz[sl, :]       # = -||z_i - z_j||^2/(2 s^2)
        kz = jnp.exp(jnp.minimum(e, 0.0))          # clamp fp cancellation; EUP
        acc_kz = acc_kz + kz
        acc_kz2 = acc_kz2 + kz * kz
        acc_msk = acc_msk + jnp.where(li_ref[sl, :] == lj, kz, 0.0)

    acc_ref[0:8, :] += acc_kz      # column sums of K_z (8-way partial)
    acc_ref[8:16, :] += acc_kz2    # sum K_z^2
    acc_ref[16:24, :] += acc_msk   # sum_{l_i == l_j} K_z


def _pick_tiles(n):
    if n % 128 != 0:
        # TODO(synk): pad + mask ragged N instead of rejecting it.
        raise ValueError(f"N={n} must be a multiple of 128")
    tile_i = 128  # small row tile bounds vreg/VMEM pressure; MXU K=Dz is tiny
    candidates = [t for t in (512, 256, 128) if n % t == 0]
    # Prefer >=2 j-tiles so the "parallel" axis shards across 2 TCs on v7x.
    multi = [t for t in candidates if n // t >= 2]
    tile_j = (multi or candidates)[0]
    return tile_i, tile_j


def hsic_adversary_loss(z, s_labels, *, num_classes, sigma=SIGMA_Z,
                        tile_i=None, tile_j=None):
    """z: [N, Dz] float; s_labels: [N] int.  Returns scalar HSIC (CKA) value."""
    # glue: format_s_onehot.  Integer labels are kept: K_s = S S^T for one-hot S
    # is exactly the label-equality matrix, evaluated as a VPU compare mask.
    while s_labels.ndim > 1:
        s_labels = jnp.squeeze(s_labels, axis=-1)
    labels = s_labels.astype(jnp.int32)

    z = z.astype(jnp.float32)
    n, dz = z.shape

    auto_i, auto_j = _pick_tiles(n)
    tile_i = auto_i if tile_i is None else tile_i
    tile_j = auto_j if tile_j is None else tile_j
    if n % tile_i != 0 or n % tile_j != 0 or tile_i % 8 != 0 or tile_j % 128 != 0:
        raise ValueError(f"invalid tiles tile_i={tile_i}, tile_j={tile_j} for N={n}")
    num_i, num_j = n // tile_i, n // tile_j

    # Fold RBF constants (O(N*Dz), amortized over the O(N^2) kernel work):
    # z is pre-scaled by 1/sigma and sq' = -||z||^2/(2 sigma^2), so the kernel
    # exponent is just sq'_i + sq'_j + <z'_i, z'_j>.
    zs = z * jnp.float32(1.0 / sigma)
    sqn = -0.5 * jnp.sum(zs * zs, axis=-1)                      # (N,)

    # O(C)/O(N) label-kernel quantities (everything K_s-related lives here).
    counts = jnp.zeros((num_classes,), jnp.float32).at[labels].add(1.0)
    sum_c2 = jnp.sum(counts * counts)
    sum_c3 = jnp.sum(counts * counts * counts)
    den_s = sum_c2 - 2.0 * sum_c3 / n + (sum_c2 * sum_c2) / (n * n)  # tr(K_sm^T K_sm)
    ms = counts[labels] / n                                     # column means of K_s
    ms_bar = sum_c2 / (n * n)                                   # grand mean of K_s
    msc = ms - 0.5 * ms_bar                                     # folds m_bar_s in

    kernel = functools.partial(_hsic_tile_kernel, strips=tile_i // 8)

    def col_spec():   # (N, 1) vectors indexed by the i (row) tile
        return pl.BlockSpec((tile_i, 1), lambda j, i: (i, 0))

    def row_spec():   # (1, N) vectors indexed by the j (column) tile
        return pl.BlockSpec((1, tile_j), lambda j, i: (0, j))

    acc = pl.pallas_call(
        kernel,
        out_shape=jax.ShapeDtypeStruct((24, n), jnp.float32),
        grid_spec=pltpu.PrefetchScalarGridSpec(
            num_scalar_prefetch=0,
            grid=(num_j, num_i),                                  # (j tiles, i tiles)
            in_specs=[
                pl.BlockSpec((tile_i, dz), lambda j, i: (i, 0)),  # z_i rows (scaled)
                pl.BlockSpec((tile_j, dz), lambda j, i: (j, 0)),  # z_j rows (scaled)
                col_spec(), row_spec(),                           # -||z||^2/(2 s^2)
                col_spec(), row_spec(),                           # labels
            ],
            out_specs=pl.BlockSpec((24, tile_j), lambda j, i: (0, j)),
        ),
        compiler_params=pltpu.CompilerParams(
            # j tiles are independent (megacore-parallel on v7x, no-op on 1-TC
            # chips); i is the reduction axis feeding the per-j accumulator.
            dimension_semantics=("parallel", "arbitrary")),
    )(zs, zs,
      sqn[:, None], sqn[None, :],
      labels[:, None], labels[None, :])

    # O(N) finalization (kept out of the kernel epilogue on purpose).
    colsum_z = jnp.sum(acc[0:8], axis=0)        # sum_i K_z[i, j]
    sum_kz2 = jnp.sum(acc[8:16])                # sum K_z^2
    sum_masked = jnp.sum(acc[16:24])            # sum_{l_i == l_j} K_z[i, j]

    mz = colsum_z / n
    mz_bar = jnp.sum(colsum_z) / (n * n)
    # sum K~_z^2 for symmetric K_z:  P - 2N sum m_z^2 + N^2 m_bar_z^2
    den_z = sum_kz2 - 2.0 * n * jnp.sum(mz * mz) + (n * n) * (mz_bar * mz_bar)

    # num = tr(K_zm^T K_sm) = sum K_z * K~_s  (centering pushed to K_s side):
    #     = sum_masked - 2 * sum_j (m_s[j] - m_bar_s/2) * colsum_z[j]
    num = sum_masked - 2.0 * jnp.sum(msc * colsum_z)

    hsic = num / jnp.sqrt(den_s * den_z)
    # torch: if torch.isnan(hsic): hsic = 0
    return jnp.where(jnp.isnan(hsic), jnp.float32(0.0), hsic)


def _reference(z, s_labels, num_classes, sigma=SIGMA_Z):
    """Pure-JAX reference mirroring the torch forward (in f32)."""
    s = jax.nn.one_hot(s_labels.astype(jnp.int32), num_classes, dtype=jnp.float32)
    z = z.astype(jnp.float32)
    k_s = s @ s.T
    sq = jnp.sum(z * z, -1, keepdims=True)
    d2 = sq + sq.T - 2.0 * (z @ z.T)
    k_z = jnp.exp(-d2 / (2.0 * sigma * sigma))
    k_s = k_s - k_s.mean(0, keepdims=True)
    k_sm = k_s.T - k_s.T.mean(0, keepdims=True)
    k_z = k_z - k_z.mean(0, keepdims=True)
    k_zm = k_z.T - k_z.T.mean(0, keepdims=True)
    num = jnp.trace(k_zm.T @ k_sm)
    den = jnp.sqrt(jnp.trace(k_sm.T @ k_sm) * jnp.trace(k_zm.T @ k_zm))
    h = num / den
    return jnp.where(jnp.isnan(h), 0.0, h)


if __name__ == "__main__":
    key = jax.random.PRNGKey(0)
    kz_key, ks_key = jax.random.split(key)

    N, DZ, NUM_CLASSES = 512, 32, 4
    z = jax.random.normal(kz_key, (N, DZ), dtype=jnp.float32)
    s = jax.random.randint(ks_key, (N,), 0, NUM_CLASSES, dtype=jnp.int32)

    # Auto tiles: tile_j=256 (2 parallel j-tiles), tile_i=128 -> a real (2, 4)
    # grid exercising per-j accumulation across the i reduction axis.
    out = hsic_adversary_loss(z, s, num_classes=NUM_CLASSES)
    out = jax.block_until_ready(out)

    ref = _reference(z, s, NUM_CLASSES)
    assert jnp.allclose(out, ref, atol=1e-5, rtol=1e-3), (out, ref)

    print("KERNEL_OK")
</pallas_src>

<mosaic_0001>
module attributes {stable_mosaic.version = 11 : i64} {
  func.func @_hsic_tile_kernel(%arg0: i32, %arg1: i32, %arg2: memref<128x32xf32, #tpu.memory_space<vmem>>, %arg3: memref<256x32xf32, #tpu.memory_space<vmem>>, %arg4: memref<128x1xf32, #tpu.memory_space<vmem>>, %arg5: memref<1x256xf32, #tpu.memory_space<vmem>>, %arg6: memref<128x1xi32, #tpu.memory_space<vmem>>, %arg7: memref<1x256xi32, #tpu.memory_space<vmem>>, %arg8: memref<24x256xf32, #tpu.memory_space<vmem>>) attributes {dimension_semantics = [#tpu.dimension_semantics<parallel>, #tpu.dimension_semantics<arbitrary>], iteration_bounds = array<i64: 2, 4>, scalar_prefetch = 0 : i64, scratch_operands = 0 : i64, tpu.core_type = #tpu.core_type<tc>, window_params = [{transform_indices = @transform_0, window_bounds = array<i64: 128, 32>}, {transform_indices = @transform_1, window_bounds = array<i64: 256, 32>}, {transform_indices = @transform_2, window_bounds = array<i64: 128, 1>}, {transform_indices = @transform_3, window_bounds = array<i64: 1, 256>}, {transform_indices = @transform_4, window_bounds = array<i64: 128, 1>}, {transform_indices = @transform_5, window_bounds = array<i64: 1, 256>}, {transform_indices = @transform_6, window_bounds = array<i64: 24, 256>}]} {
    %c0_i32 = arith.constant 0 : i32
    %0 = arith.cmpi eq, %arg1, %c0_i32 : i32
    %1 = arith.extui %0 : i1 to i32
    %c0_i32_0 = arith.constant 0 : i32
    %2 = arith.cmpi ne, %1, %c0_i32_0 : i32
    scf.if %2 {
      %cst_104 = arith.constant 0.000000e+00 : f32
      %296 = vector.broadcast %cst_104 : f32 to vector<24x256xf32>
      %c0_105 = arith.constant 0 : index
      %c0_106 = arith.constant 0 : index
      %297 = vector.load %arg8[%c0_105, %c0_106] : memref<24x256xf32, #tpu.memory_space<vmem>>, vector<24x256xf32>
      tpu.vector_store %arg8[%c0_105, %c0_106], %296 {strides = array<i32>} : memref<24x256xf32, #tpu.memory_space<vmem>>, vector<24x256xf32>,
    } else {
    }
    %c0 = arith.constant 0 : index
    %c0_1 = arith.constant 0 : index
    %3 = vector.load %arg2[%c0, %c0_1] : memref<128x32xf32, #tpu.memory_space<vmem>>, vector<128x32xf32>
    %c0_2 = arith.constant 0 : index
    %c0_3 = arith.constant 0 : index
    %4 = vector.load %arg3[%c0_2, %c0_3] : memref<256x32xf32, #tpu.memory_space<vmem>>, vector<256x32xf32>
    %cst = arith.constant dense<0.000000e+00> : vector<128x256xf32>
    %5 = tpu.matmul %3, %4, %cst {dimension_numbers = #tpu.dot_dimension_numbers<[1], [1], [0], [0], [0, 0, 1, 0], [], []>} : vector<128x32xf32>, vector<256x32xf32>, vector<128x256xf32> -> vector<128x256xf32>
    %c0_4 = arith.constant 0 : index
    %c0_5 = arith.constant 0 : index
    %6 = vector.load %arg5[%c0_4, %c0_5] : memref<1x256xf32, #tpu.memory_space<vmem>>, vector<1x256xf32>
    %7 = vector.shape_cast %6 : vector<1x256xf32> to vector<1x256xf32>
    %8 = vector.broadcast %7 : vector<1x256xf32> to vector<8x256xf32>
    %c0_6 = arith.constant 0 : index
    %c0_7 = arith.constant 0 : index
    %9 = vector.load %arg7[%c0_6, %c0_7] : memref<1x256xi32, #tpu.memory_space<vmem>>, vector<1x256xi32>
    %10 = vector.shape_cast %9 : vector<1x256xi32> to vector<1x256xi32>
    %11 = vector.broadcast %10 : vector<1x256xi32> to vector<8x256xi32>
    %cst_8 = arith.constant 0.000000e+00 : f32
    %12 = vector.broadcast %cst_8 : f32 to vector<8x256xf32>
    %cst_9 = arith.constant 0.000000e+00 : f32
    %13 = vector.broadcast %cst_9 : f32 to vector<8x256xf32>
    %cst_10 = arith.constant 0.000000e+00 : f32
    %14 = vector.broadcast %cst_10 : f32 to vector<8x256xf32>
    %c0_11 = arith.constant 0 : index
    %c0_12 = arith.constant 0 : index
    %15 = vector.load %arg4[%c0_11, %c0_12] : memref<128x1xf32, #tpu.memory_space<vmem>>, vector<8x1xf32>
    %16 = vector.broadcast %15 : vector<8x1xf32> to vector<8x256xf32>
    %17 = arith.addf %16, %8 : vector<8x256xf32>
    %18 = vector.extract_strided_slice %5 {offsets = [0, 0], sizes = [8, 256], strides = [1, 1]} : vector<128x256xf32> to vector<8x256xf32>
    %19 = arith.addf %17, %18 : vector<8x256xf32>
    %cst_13 = arith.constant 0.000000e+00 : f32
    %20 = vector.broadcast %cst_13 : f32 to vector<8x256xf32>
    %21 = arith.minimumf %19, %20 : vector<8x256xf32>
    %22 = math.exp %21 : vector<8x256xf32>
    %23 = arith.addf %12, %22 : vector<8x256xf32>
    %24 = arith.mulf %22, %22 : vector<8x256xf32>
    %25 = arith.addf %13, %24 : vector<8x256xf32>
    %c0_14 = arith.constant 0 : index
    %c0_15 = arith.constant 0 : index
    %26 = vector.load %arg6[%c0_14, %c0_15] : memref<128x1xi32, #tpu.memory_space<vmem>>, vector<8x1xi32>
    %27 = vector.broadcast %26 : vector<8x1xi32> to vector<8x256xi32>
    %28 = arith.cmpi eq, %27, %11 : vector<8x256xi32>
    %cst_16 = arith.constant 0.000000e+00 : f32
    %29 = vector.broadcast %cst_16 : f32 to vector<8x256xf32>
    %30 = arith.select %28, %22, %29 : vector<8x256xi1>, vector<8x256xf32>
    %31 = arith.addf %14, %30 : vector<8x256xf32>
    %c8 = arith.constant 8 : index
    %c0_17 = arith.constant 0 : index
    %32 = vector.load %arg4[%c8, %c0_17] : memref<128x1xf32, #tpu.memory_space<vmem>>, vector<8x1xf32>
    %33 = vector.broadcast %32 : vector<8x1xf32> to vector<8x256xf32>
    %34 = arith.addf %33, %8 : vector<8x256xf32>
    %35 = vector.extract_strided_slice %5 {offsets = [8, 0], sizes = [8, 256], strides = [1, 1]} : vector<128x256xf32> to vector<8x256xf32>
    %36 = arith.addf %34, %35 : vector<8x256xf32>
    %cst_18 = arith.constant 0.000000e+00 : f32
    %37 = vector.broadcast %cst_18 : f32 to vector<8x256xf32>
    %38 = arith.minimumf %36, %37 : vector<8x256xf32>
    %39 = math.exp %38 : vector<8x256xf32>
    %40 = arith.addf %23, %39 : vector<8x256xf32>
    %41 = arith.mulf %39, %39 : vector<8x256xf32>
    %42 = arith.addf %25, %41 : vector<8x256xf32>
    %c8_19 = arith.constant 8 : index
    %c0_20 = arith.constant 0 : index
    %43 = vector.load %arg6[%c8_19, %c0_20] : memref<128x1xi32, #tpu.memory_space<vmem>>, vector<8x1xi32>
    %44 = vector.broadcast %43 : vector<8x1xi32> to vector<8x256xi32>
    %45 = arith.cmpi eq, %44, %11 : vector<8x256xi32>
    %cst_21 = arith.constant 0.000000e+00 : f32
    %46 = vector.broadcast %cst_21 : f32 to vector<8x256xf32>
    %47 = arith.select %45, %39, %46 : vector<8x256xi1>, vector<8x256xf32>
    %48 = arith.addf %31, %47 : vector<8x256xf32>
    %c16 = arith.constant 16 : index
    %c0_22 = arith.constant 0 : index
    %49 = vector.load %arg4[%c16, %c0_22] : memref<128x1xf32, #tpu.memory_space<vmem>>, vector<8x1xf32>
    %50 = vector.broadcast %49 : vector<8x1xf32> to vector<8x256xf32>
    %51 = arith.addf %50, %8 : vector<8x256xf32>
    %52 = vector.extract_strided_slice %5 {offsets = [16, 0], sizes = [8, 256], strides = [1, 1]} : vector<128x256xf32> to vector<8x256xf32>
    %53 = arith.addf %51, %52 : vector<8x256xf32>
    %cst_23 = arith.constant 0.000000e+00 : f32
    %54 = vector.broadcast %cst_23 : f32 to vector<8x256xf32>
    %55 = arith.minimumf %53, %54 : vector<8x256xf32>
    %56 = math.exp %55 : vector<8x256xf32>
    %57 = arith.addf %40, %56 : vector<8x256xf32>
    %58 = arith.mulf %56, %56 : vector<8x256xf32>
    %59 = arith.addf %42, %58 : vector<8x256xf32>
    %c16_24 = arith.constant 16 : index
    %c0_25 = arith.constant 0 : index
    %60 = vector.load %arg6[%c16_24, %c0_25] : memref<128x1xi32, #tpu.memory_space<vmem>>, vector<8x1xi32>
    %61 = vector.broadcast %60 : vector<8x1xi32> to vector<8x256xi32>
    %62 = arith.cmpi eq, %61, %11 : vector<8x256xi32>
    %cst_26 = arith.constant 0.000000e+00 : f32
    %63 = vector.broadcast %cst_26 : f32 to vector<8x256xf32>
    %64 = arith.select %62, %56, %63 : vector<8x256xi1>, vector<8x256xf32>
    %65 = arith.addf %48, %64 : vector<8x256xf32>
    %c24 = arith.constant 24 : index
    %c0_27 = arith.constant 0 : index
    %66 = vector.load %arg4[%c24, %c0_27] : memref<128x1xf32, #tpu.memory_space<vmem>>, vector<8x1xf32>
    %67 = vector.broadcast %66 : vector<8x1xf32> to vector<8x256xf32>
    %68 = arith.addf %67, %8 : vector<8x256xf32>
    %69 = vector.extract_strided_slice %5 {offsets = [24, 0], sizes = [8, 256], strides = [1, 1]} : vector<128x256xf32> to vector<8x256xf32>
    %70 = arith.addf %68, %69 : vector<8x256xf32>
    %cst_28 = arith.constant 0.000000e+00 : f32
    %71 = vector.broadcast %cst_28 : f32 to vector<8x256xf32>
    %72 = arith.minimumf %70, %71 : vector<8x256xf32>
    %73 = math.exp %72 : vector<8x256xf32>
    %74 = arith.addf %57, %73 : vector<8x256xf32>
    %75 = arith.mulf %73, %73 : vector<8x256xf32>
    %76 = arith.addf %59, %75 : vector<8x256xf32>
    %c24_29 = arith.constant 24 : index
    %c0_30 = arith.constant 0 : index
    %77 = vector.load %arg6[%c24_29, %c0_30] : memref<128x1xi32, #tpu.memory_space<vmem>>, vector<8x1xi32>
    %78 = vector.broadcast %77 : vector<8x1xi32> to vector<8x256xi32>
    %79 = arith.cmpi eq, %78, %11 : vector<8x256xi32>
    %cst_31 = arith.constant 0.000000e+00 : f32
    %80 = vector.broadcast %cst_31 : f32 to vector<8x256xf32>
    %81 = arith.select %79, %73, %80 : vector<8x256xi1>, vector<8x256xf32>
    %82 = arith.addf %65, %81 : vector<8x256xf32>
    %c32 = arith.constant 32 : index
    %c0_32 = arith.constant 0 : index
    %83 = vector.load %arg4[%c32, %c0_32] : memref<128x1xf32, #tpu.memory_space<vmem>>, vector<8x1xf32>
    %84 = vector.broadcast %83 : vector<8x1xf32> to vector<8x256xf32>
    %85 = arith.addf %84, %8 : vector<8x256xf32>
    %86 = vector.extract_strided_slice %5 {offsets = [32, 0], sizes = [8, 256], strides = [1, 1]} : vector<128x256xf32> to vector<8x256xf32>
    %87 = arith.addf %85, %86 : vector<8x256xf32>
    %cst_33 = arith.constant 0.000000e+00 : f32
    %88 = vector.broadcast %cst_33 : f32 to vector<8x256xf32>
    %89 = arith.minimumf %87, %88 : vector<8x256xf32>
    %90 = math.exp %89 : vector<8x256xf32>
    %91 = arith.addf %74, %90 : vector<8x256xf32>
    %92 = arith.mulf %90, %90 : vector<8x256xf32>
    %93 = arith.addf %76, %92 : vector<8x256xf32>
    %c32_34 = arith.constant 32 : index
    %c0_35 = arith.constant 0 : index
    %94 = vector.load %arg6[%c32_34, %c0_35] : memref<128x1xi32, #tpu.memory_space<vmem>>, vector<8x1xi32>
    %95 = vector.broadcast %94 : vector<8x1xi32> to vector<8x256xi32>
    %96 = arith.cmpi eq, %95, %11 : vector<8x256xi32>
    %cst_36 = arith.constant 0.000000e+00 : f32
    %97 = vector.broadcast %cst_36 : f32 to vector<8x256xf32>
    %98 = arith.select %96, %90, %97 : vector<8x256xi1>, vector<8x256xf32>
    %99 = arith.addf %82, %98 : vector<8x256xf32>
    %c40 = arith.constant 40 : index
    %c0_37 = arith.constant 0 : index
    %100 = vector.load %arg4[%c40, %c0_37] : memref<128x1xf32, #tpu.memory_space<vmem>>, vector<8x1xf32>
    %101 = vector.broadcast %100 : vector<8x1xf32> to vector<8x256xf32>
    %102 = arith.addf %101, %8 : vector<8x256xf32>
    %103 = vector.extract_strided_slice %5 {offsets = [40, 0], sizes = [8, 256], strides = [1, 1]} : vector<128x256xf32> to vector<8x256xf32>
    %104 = arith.addf %102, %103 : vector<8x256xf32>
    %cst_38 = arith.constant 0.000000e+00 : f32
    %105 = vector.broadcast %cst_38 : f32 to vector<8x256xf32>
    %106 = arith.minimumf %104, %105 : vector<8x256xf32>
    %107 = math.exp %106 : vector<8x256xf32>
    %108 = arith.addf %91, %107 : vector<8x256xf32>
    %109 = arith.mulf %107, %107 : vector<8x256xf32>
    %110 = arith.addf %93, %109 : vector<8x256xf32>
    %c40_39 = arith.constant 40 : index
    %c0_40 = arith.constant 0 : index
    %111 = vector.load %arg6[%c40_39, %c0_40] : memref<128x1xi32, #tpu.memory_space<vmem>>, vector<8x1xi32>
    %112 = vector.broadcast %111 : vector<8x1xi32> to vector<8x256xi32>
    %113 = arith.cmpi eq, %112, %11 : vector<8x256xi32>
    %cst_41 = arith.constant 0.000000e+00 : f32
    %114 = vector.broadcast %cst_41 : f32 to vector<8x256xf32>
    %115 = arith.select %113, %107, %114 : vector<8x256xi1>, vector<8x256xf32>
    %116 = arith.addf %99, %115 : vector<8x256xf32>
    %c48 = arith.constant 48 : index
    %c0_42 = arith.constant 0 : index
    %117 = vector.load %arg4[%c48, %c0_42] : memref<128x1xf32, #tpu.memory_space<vmem>>, vector<8x1xf32>
    %118 = vector.broadcast %117 : vector<8x1xf32> to vector<8x256xf32>
    %119 = arith.addf %118, %8 : vector<8x256xf32>
    %120 = vector.extract_strided_slice %5 {offsets = [48, 0], sizes = [8, 256], strides = [1, 1]} : vector<128x256xf32> to vector<8x256xf32>
    %121 = arith.addf %119, %120 : vector<8x256xf32>
    %cst_43 = arith.constant 0.000000e+00 : f32
    %122 = vector.broadcast %cst_43 : f32 to vector<8x256xf32>
    %123 = arith.minimumf %121, %122 : vector<8x256xf32>
    %124 = math.exp %123 : vector<8x256xf32>
    %125 = arith.addf %108, %124 : vector<8x256xf32>
    %126 = arith.mulf %124, %124 : vector<8x256xf32>
    %127 = arith.addf %110, %126 : vector<8x256xf32>
    %c48_44 = arith.constant 48 : index
    %c0_45 = arith.constant 0 : index
    %128 = vector.load %arg6[%c48_44, %c0_45] : memref<128x1xi32, #tpu.memory_space<vmem>>, vector<8x1xi32>
    %129 = vector.broadcast %128 : vector<8x1xi32> to vector<8x256xi32>
    %130 = arith.cmpi eq, %129, %11 : vector<8x256xi32>
    %cst_46 = arith.constant 0.000000e+00 : f32
    %131 = vector.broadcast %cst_46 : f32 to vector<8x256xf32>
    %132 = arith.select %130, %124, %131 : vector<8x256xi1>, vector<8x256xf32>
    %133 = arith.addf %116, %132 : vector<8x256xf32>
    %c56 = arith.constant 56 : index
    %c0_47 = arith.constant 0 : index
    %134 = vector.load %arg4[%c56, %c0_47] : memref<128x1xf32, #tpu.memory_space<vmem>>, vector<8x1xf32>
    %135 = vector.broadcast %134 : vector<8x1xf32> to vector<8x256xf32>
    %136 = arith.addf %135, %8 : vector<8x256xf32>
    %137 = vector.extract_strided_slice %5 {offsets = [56, 0], sizes = [8, 256], strides = [1, 1]} : vector<128x256xf32> to vector<8x256xf32>
    %138 = arith.addf %136, %137 : vector<8x256xf32>
    %cst_48 = arith.constant 0.000000e+00 : f32
    %139 = vector.broadcast %cst_48 : f32 to vector<8x256xf32>
    %140 = arith.minimumf %138, %139 : vector<8x256xf32>
    %141 = math.exp %140 : vector<8x256xf32>
    %142 = arith.addf %125, %141 : vector<8x256xf32>
    %143 = arith.mulf %141, %141 : vector<8x256xf32>
    %144 = arith.addf %127, %143 : vector<8x256xf32>
    %c56_49 = arith.constant 56 : index
    %c0_50 = arith.constant 0 : index
    %145 = vector.load %arg6[%c56_49, %c0_50] : memref<128x1xi32, #tpu.memory_space<vmem>>, vector<8x1xi32>
    %146 = vector.broadcast %145 : vector<8x1xi32> to vector<8x256xi32>
    %147 = arith.cmpi eq, %146, %11 : vector<8x256xi32>
    %cst_51 = arith.constant 0.000000e+00 : f32
    %148 = vector.broadcast %cst_51 : f32 to vector<8x256xf32>
    %149 = arith.select %147, %141, %148 : vector<8x256xi1>, vector<8x256xf32>
    %150 = arith.addf %133, %149 : vector<8x256xf32>
    %c64 = arith.constant 64 : index
    %c0_52 = arith.constant 0 : index
    %151 = vector.load %arg4[%c64, %c0_52] : memref<128x1xf32, #tpu.memory_space<vmem>>, vector<8x1xf32>
    %152 = vector.broadcast %151 : vector<8x1xf32> to vector<8x256xf32>
    %153 = arith.addf %152, %8 : vector<8x256xf32>
    %154 = vector.extract_strided_slice %5 {offsets = [64, 0], sizes = [8, 256], strides = [1, 1]} : vector<128x256xf32> to vector<8x256xf32>
    %155 = arith.addf %153, %154 : vector<8x256xf32>
    %cst_53 = arith.constant 0.000000e+00 : f32
    %156 = vector.broadcast %cst_53 : f32 to vector<8x256xf32>
    %157 = arith.minimumf %155, %156 : vector<8x256xf32>
    %158 = math.exp %157 : vector<8x256xf32>
    %159 = arith.addf %142, %158 : vector<8x256xf32>
    %160 = arith.mulf %158, %158 : vector<8x256xf32>
    %161 = arith.addf %144, %160 : vector<8x256xf32>
    %c64_54 = arith.constant 64 : index
    %c0_55 = arith.constant 0 : index
    %162 = vector.load %arg6[%c64_54, %c0_55] : memref<128x1xi32, #tpu.memory_space<vmem>>, vector<8x1xi32>
    %163 = vector.broadcast %162 : vector<8x1xi32> to vector<8x256xi32>
    %164 = arith.cmpi eq, %163, %11 : vector<8x256xi32>
    %cst_56 = arith.constant 0.000000e+00 : f32
    %165 = vector.broadcast %cst_56 : f32 to vector<8x256xf32>
    %166 = arith.select %164, %158, %165 : vector<8x256xi1>, vector<8x256xf32>
    %167 = arith.addf %150, %166 : vector<8x256xf32>
    %c72 = arith.constant 72 : index
    %c0_57 = arith.constant 0 : index
    %168 = vector.load %arg4[%c72, %c0_57] : memref<128x1xf32, #tpu.memory_space<vmem>>, vector<8x1xf32>
    %169 = vector.broadcast %168 : vector<8x1xf32> to vector<8x256xf32>
    %170 = arith.addf %169, %8 : vector<8x256xf32>
    %171 = vector.extract_strided_slice %5 {offsets = [72, 0], sizes = [8, 256], strides = [1, 1]} : vector<128x256xf32> to vector<8x256xf32>
    %172 = arith.addf %170, %171 : vector<8x256xf32>
    %cst_58 = arith.constant 0.000000e+00 : f32
    %173 = vector.broadcast %cst_58 : f32 to vector<8x256xf32>
    %174 = arith.minimumf %172, %173 : vector<8x256xf32>
    %175 = math.exp %174 : vector<8x256xf32>
    %176 = arith.addf %159, %175 : vector<8x256xf32>
    %177 = arith.mulf %175, %175 : vector<8x256xf32>
    %178 = arith.addf %161, %177 : vector<8x256xf32>
    %c72_59 = arith.constant 72 : index
    %c0_60 = arith.constant 0 : index
    %179 = vector.load %arg6[%c72_59, %c0_60] : memref<128x1xi32, #tpu.memory_space<vmem>>, vector<8x1xi32>
    %180 = vector.broadcast %179 : vector<8x1xi32> to vector<8x256xi32>
    %181 = arith.cmpi eq, %180, %11 : vector<8x256xi32>
    %cst_61 = arith.constant 0.000000e+00 : f32
    %182 = vector.broadcast %cst_61 : f32 to vector<8x256xf32>
    %183 = arith.select %181, %175, %182 : vector<8x256xi1>, vector<8x256xf32>
    %184 = arith.addf %167, %183 : vector<8x256xf32>
    %c80 = arith.constant 80 : index
    %c0_62 = arith.constant 0 : index
    %185 = vector.load %arg4[%c80, %c0_62] : memref<128x1xf32, #tpu.memory_space<vmem>>, vector<8x1xf32>
    %186 = vector.broadcast %185 : vector<8x1xf32> to vector<8x256xf32>
    %187 = arith.addf %186, %8 : vector<8x256xf32>
    %188 = vector.extract_strided_slice %5 {offsets = [80, 0], sizes = [8, 256], strides = [1, 1]} : vector<128x256xf32> to vector<8x256xf32>
    %189 = arith.addf %187, %188 : vector<8x256xf32>
    %cst_63 = arith.constant 0.000000e+00 : f32
    %190 = vector.broadcast %cst_63 : f32 to vector<8x256xf32>
    %191 = arith.minimumf %189, %190 : vector<8x256xf32>
    %192 = math.exp %191 : vector<8x256xf32>
    %193 = arith.addf %176, %192 : vector<8x256xf32>
    %194 = arith.mulf %192, %192 : vector<8x256xf32>
    %195 = arith.addf %178, %194 : vector<8x256xf32>
    %c80_64 = arith.constant 80 : index
    %c0_65 = arith.constant 0 : index
    %196 = vector.load %arg6[%c80_64, %c0_65] : memref<128x1xi32, #tpu.memory_space<vmem>>, vector<8x1xi32>
    %197 = vector.broadcast %196 : vector<8x1xi32> to vector<8x256xi32>
    %198 = arith.cmpi eq, %197, %11 : vector<8x256xi32>
    %cst_66 = arith.constant 0.000000e+00 : f32
    %199 = vector.broadcast %cst_66 : f32 to vector<8x256xf32>
    %200 = arith.select %198, %192, %199 : vector<8x256xi1>, vector<8x256xf32>
    %201 = arith.addf %184, %200 : vector<8x256xf32>
    %c88 = arith.constant 88 : index
    %c0_67 = arith.constant 0 : index
    %202 = vector.load %arg4[%c88, %c0_67] : memref<128x1xf32, #tpu.memory_space<vmem>>, vector<8x1xf32>
    %203 = vector.broadcast %202 : vector<8x1xf32> to vector<8x256xf32>
    %204 = arith.addf %203, %8 : vector<8x256xf32>
    %205 = vector.extract_strided_slice %5 {offsets = [88, 0], sizes = [8, 256], strides = [1, 1]} : vector<128x256xf32> to vector<8x256xf32>
    %206 = arith.addf %204, %205 : vector<8x256xf32>
    %cst_68 = arith.constant 0.000000e+00 : f32
    %207 = vector.broadcast %cst_68 : f32 to vector<8x256xf32>
    %208 = arith.minimumf %206, %207 : vector<8x256xf32>
    %209 = math.exp %208 : vector<8x256xf32>
    %210 = arith.addf %193, %209 : vector<8x256xf32>
    %211 = arith.mulf %209, %209 : vector<8x256xf32>
    %212 = arith.addf %195, %211 : vector<8x256xf32>
    %c88_69 = arith.constant 88 : index
    %c0_70 = arith.constant 0 : index
    %213 = vector.load %arg6[%c88_69, %c0_70] : memref<128x1xi32, #tpu.memory_space<vmem>>, vector<8x1xi32>
    %214 = vector.broadcast %213 : vector<8x1xi32> to vector<8x256xi32>
    %215 = arith.cmpi eq, %214, %11 : vector<8x256xi32>
    %cst_71 = arith.constant 0.000000e+00 : f32
    %216 = vector.broadcast %cst_71 : f32 to vector<8x256xf32>
    %217 = arith.select %215, %209, %216 : vector<8x256xi1>, vector<8x256xf32>
    %218 = arith.addf %201, %217 : vector<8x256xf32>
    %c96 = arith.constant 96 : index
    %c0_72 = arith.constant 0 : index
    %219 = vector.load %arg4[%c96, %c0_72] : memref<128x1xf32, #tpu.memory_space<vmem>>, vector<8x1xf32>
    %220 = vector.broadcast %219 : vector<8x1xf32> to vector<8x256xf32>
    %221 = arith.addf %220, %8 : vector<8x256xf32>
    %222 = vector.extract_strided_slice %5 {offsets = [96, 0], sizes = [8, 256], strides = [1, 1]} : vector<128x256xf32> to vector<8x256xf32>
    %223 = arith.addf %221, %222 : vector<8x256xf32>
    %cst_73 = arith.constant 0.000000e+00 : f32
    %224 = vector.broadcast %cst_73 : f32 to vector<8x256xf32>
    %225 = arith.minimumf %223, %224 : vector<8x256xf32>
    %226 = math.exp %225 : vector<8x256xf32>
    %227 = arith.addf %210, %226 : vector<8x256xf32>
    %228 = arith.mulf %226, %226 : vector<8x256xf32>
    %229 = arith.addf %212, %228 : vector<8x256xf32>
    %c96_74 = arith.constant 96 : index
    %c0_75 = arith.constant 0 : index
    %230 = vector.load %arg6[%c96_74, %c0_75] : memref<128x1xi32, #tpu.memory_space<vmem>>, vector<8x1xi32>
    %231 = vector.broadcast %230 : vector<8x1xi32> to vector<8x256xi32>
    %232 = arith.cmpi eq, %231, %11 : vector<8x256xi32>
    %cst_76 = arith.constant 0.000000e+00 : f32
    %233 = vector.broadcast %cst_76 : f32 to vector<8x256xf32>
    %234 = arith.select %232, %226, %233 : vector<8x256xi1>, vector<8x256xf32>
    %235 = arith.addf %218, %234 : vector<8x256xf32>
    %c104 = arith.constant 104 : index
    %c0_77 = arith.constant 0 : index
    %236 = vector.load %arg4[%c104, %c0_77] : memref<128x1xf32, #tpu.memory_space<vmem>>, vector<8x1xf32>
    %237 = vector.broadcast %236 : vector<8x1xf32> to vector<8x256xf32>
    %238 = arith.addf %237, %8 : vector<8x256xf32>
    %239 = vector.extract_strided_slice %5 {offsets = [104, 0], sizes = [8, 256], strides = [1, 1]} : vector<128x256xf32> to vector<8x256xf32>
    %240 = arith.addf %238, %239 : vector<8x256xf32>
    %cst_78 = arith.constant 0.000000e+00 : f32
    %241 = vector.broadcast %cst_78 : f32 to vector<8x256xf32>
    %242 = arith.minimumf %240, %241 : vector<8x256xf32>
    %243 = math.exp %242 : vector<8x256xf32>
    %244 = arith.addf %227, %243 : vector<8x256xf32>
    %245 = arith.mulf %243, %243 : vector<8x256xf32>
    %246 = arith.addf %229, %245 : vector<8x256xf32>
    %c104_79 = arith.constant 104 : index
    %c0_80 = arith.constant 0 : index
    %247 = vector.load %arg6[%c104_79, %c0_80] : memref<128x1xi32, #tpu.memory_space<vmem>>, vector<8x1xi32>
    %248 = vector.broadcast %247 : vector<8x1xi32> to vector<8x256xi32>
    %249 = arith.cmpi eq, %248, %11 : vector<8x256xi32>
    %cst_81 = arith.constant 0.000000e+00 : f32
    %250 = vector.broadcast %cst_81 : f32 to vector<8x256xf32>
    %251 = arith.select %249, %243, %250 : vector<8x256xi1>, vector<8x256xf32>
    %252 = arith.addf %235, %251 : vector<8x256xf32>
    %c112 = arith.constant 112 : index
    %c0_82 = arith.constant 0 : index
    %253 = vector.load %arg4[%c112, %c0_82] : memref<128x1xf32, #tpu.memory_space<vmem>>, vector<8x1xf32>
    %254 = vector.broadcast %253 : vector<8x1xf32> to vector<8x256xf32>
    %255 = arith.addf %254, %8 : vector<8x256xf32>
    %256 = vector.extract_strided_slice %5 {offsets = [112, 0], sizes = [8, 256], strides = [1, 1]} : vector<128x256xf32> to vector<8x256xf32>
    %257 = arith.addf %255, %256 : vector<8x256xf32>
    %cst_83 = arith.constant 0.000000e+00 : f32
    %258 = vector.broadcast %cst_83 : f32 to vector<8x256xf32>
    %259 = arith.minimumf %257, %258 : vector<8x256xf32>
    %260 = math.exp %259 : vector<8x256xf32>
    %261 = arith.addf %244, %260 : vector<8x256xf32>
    %262 = arith.mulf %260, %260 : vector<8x256xf32>
    %263 = arith.addf %246, %262 : vector<8x256xf32>
    %c112_84 = arith.constant 112 : index
    %c0_85 = arith.constant 0 : index
    %264 = vector.load %arg6[%c112_84, %c0_85] : memref<128x1xi32, #tpu.memory_space<vmem>>, vector<8x1xi32>
    %265 = vector.broadcast %264 : vector<8x1xi32> to vector<8x256xi32>
    %266 = arith.cmpi eq, %265, %11 : vector<8x256xi32>
    %cst_86 = arith.constant 0.000000e+00 : f32
    %267 = vector.broadcast %cst_86 : f32 to vector<8x256xf32>
    %268 = arith.select %266, %260, %267 : vector<8x256xi1>, vector<8x256xf32>
    %269 = arith.addf %252, %268 : vector<8x256xf32>
    %c120 = arith.constant 120 : index
    %c0_87 = arith.constant 0 : index
    %270 = vector.load %arg4[%c120, %c0_87] : memref<128x1xf32, #tpu.memory_space<vmem>>, vector<8x1xf32>
    %271 = vector.broadcast %270 : vector<8x1xf32> to vector<8x256xf32>
    %272 = arith.addf %271, %8 : vector<8x256xf32>
    %273 = vector.extract_strided_slice %5 {offsets = [120, 0], sizes = [8, 256], strides = [1, 1]} : vector<128x256xf32> to vector<8x256xf32>
    %274 = arith.addf %272, %273 : vector<8x256xf32>
    %cst_88 = arith.constant 0.000000e+00 : f32
    %275 = vector.broadcast %cst_88 : f32 to vector<8x256xf32>
    %276 = arith.minimumf %274, %275 : vector<8x256xf32>
    %277 = math.exp %276 : vector<8x256xf32>
    %278 = arith.addf %261, %277 : vector<8x256xf32>
    %279 = arith.mulf %277, %277 : vector<8x256xf32>
    %280 = arith.addf %263, %279 : vector<8x256xf32>
    %c120_89 = arith.constant 120 : index
    %c0_90 = arith.constant 0 : index
    %281 = vector.load %arg6[%c120_89, %c0_90] : memref<128x1xi32, #tpu.memory_space<vmem>>, vector<8x1xi32>
    %282 = vector.broadcast %281 : vector<8x1xi32> to vector<8x256xi32>
    %283 = arith.cmpi eq, %282, %11 : vector<8x256xi32>
    %cst_91 = arith.constant 0.000000e+00 : f32
    %284 = vector.broadcast %cst_91 : f32 to vector<8x256xf32>
    %285 = arith.select %283, %277, %284 : vector<8x256xi1>, vector<8x256xf32>
    %286 = arith.addf %269, %285 : vector<8x256xf32>
    %c0_92 = arith.constant 0 : index
    %c0_93 = arith.constant 0 : index
    %287 = vector.load %arg8[%c0_92, %c0_93] : memref<24x256xf32, #tpu.memory_space<vmem>>, vector<8x256xf32>
    %288 = arith.addf %287, %278 : vector<8x256xf32>
    %c0_94 = arith.constant 0 : index
    %c0_95 = arith.constant 0 : index
    %289 = vector.load %arg8[%c0_94, %c0_95] : memref<24x256xf32, #tpu.memory_space<vmem>>, vector<8x256xf32>
    tpu.vector_store %arg8[%c0_94, %c0_95], %288 {strides = array<i32>} : memref<24x256xf32, #tpu.memory_space<vmem>>, vector<8x256xf32>,
    %c8_96 = arith.constant 8 : index
    %c0_97 = arith.constant 0 : index
    %290 = vector.load %arg8[%c8_96, %c0_97] : memref<24x256xf32, #tpu.memory_space<vmem>>, vector<8x256xf32>
    %291 = arith.addf %290, %280 : vector<8x256xf32>
    %c8_98 = arith.constant 8 : index
    %c0_99 = arith.constant 0 : index
    %292 = vector.load %arg8[%c8_98, %c0_99] : memref<24x256xf32, #tpu.memory_space<vmem>>, vector<8x256xf32>
    tpu.vector_store %arg8[%c8_98, %c0_99], %291 {strides = array<i32>} : memref<24x256xf32, #tpu.memory_space<vmem>>, vector<8x256xf32>,
    %c16_100 = arith.constant 16 : index
    %c0_101 = arith.constant 0 : index
    %293 = vector.load %arg8[%c16_100, %c0_101] : memref<24x256xf32, #tpu.memory_space<vmem>>, vector<8x256xf32>
    %294 = arith.addf %293, %286 : vector<8x256xf32>
    %c16_102 = arith.constant 16 : index
    %c0_103 = arith.constant 0 : index
    %295 = vector.load %arg8[%c16_102, %c0_103] : memref<24x256xf32, #tpu.memory_space<vmem>>, vector<8x256xf32>
    tpu.vector_store %arg8[%c16_102, %c0_103], %294 {strides = array<i32>} : memref<24x256xf32, #tpu.memory_space<vmem>>, vector<8x256xf32>,
    return
  }
  func.func @transform_0(%arg0: i32, %arg1: i32) -> (i32, i32) {
    %c0_i32 = arith.constant 0 : i32
    %c0_i32_0 = arith.constant 0 : i32
    return %arg1, %c0_i32 : i32, i32
  }
  func.func @transform_1(%arg0: i32, %arg1: i32) -> (i32, i32) {
    %c0_i32 = arith.constant 0 : i32
    %c0_i32_0 = arith.constant 0 : i32
    return %arg0, %c0_i32 : i32, i32
  }
  func.func @transform_2(%arg0: i32, %arg1: i32) -> (i32, i32) {
    %c0_i32 = arith.constant 0 : i32
    %c0_i32_0 = arith.constant 0 : i32
    return %arg1, %c0_i32 : i32, i32
  }
  func.func @transform_3(%arg0: i32, %arg1: i32) -> (i32, i32) {
    %c0_i32 = arith.constant 0 : i32
    %c0_i32_0 = arith.constant 0 : i32
    return %c0_i32, %arg0 : i32, i32
  }
  func.func @transform_4(%arg0: i32, %arg1: i32) -> (i32, i32) {
    %c0_i32 = arith.constant 0 : i32
    %c0_i32_0 = arith.constant 0 : i32
    return %arg1, %c0_i32 : i32, i32
  }
  func.func @transform_5(%arg0: i32, %arg1: i32) -> (i32, i32) {
    %c0_i32 = arith.constant 0 : i32
    %c0_i32_0 = arith.constant 0 : i32
    return %c0_i32, %arg0 : i32, i32
  }
  func.func @transform_6(%arg0: i32, %arg1: i32) -> (i32, i32) {
    %c0_i32 = arith.constant 0 : i32
    %c0_i32_0 = arith.constant 0 : i32
    return %c0_i32, %arg0 : i32, i32
  }
}

</mosaic_0001>

<bundles_post_ra>
// kernel: tpu_custom_call.1
= control target key start
LH: loop header
LB: loop body
LE: loop exit
PB: predicated region body
PF: predicated region fallthrough
CT: control target
= control target key end

     0   :  { %s2753_s0 = inlined_call_operand.vmem [shape: f32[512,32], index: 0, kind: input, shape index: {}]   ;;  %s2754_s1 = inlined_call_operand.vmem [shape: f32[512,32], index: 1, kind: input, shape index: {}]   ;;  %s2755_s2 = inlined_call_operand.vmem [shape: f32[512,1], index: 2, kind: input, shape index: {}]   ;;  %s2756_s3 = inlined_call_operand.vmem [shape: f32[1,512], index: 3, kind: input, shape index: {}]   ;;  %s2757_s4 = inlined_call_operand.vmem [shape: s32[512,1], index: 4, kind: input, shape index: {}]   ;;  %s2758_s5 = inlined_call_operand.vmem [shape: s32[1,512], index: 5, kind: input, shape index: {}]   ;;  %s2759_s6 = inlined_call_operand.hbm [shape: f32[24,512], index: 6, kind: output, shape index: {}]  }
   0x1   :  { %2764 = sst [smem:[#allocation10_spill]] %s2753_s0 }
   0x2   :  { %11 = vsyncpa [#allocation3], 0 }
   0x3   :  { %13 = vsyncpa [#allocation3 + $0x1], 0  ;;  %s1902_s21 = smov 0   ;;  %s1904_s22 = smov 0  }
   0x4   :  { %s1906_s23 = smov 0   ;;  %s1908_s24 = smov 0  }
   0x5   :  { %s1910_s25 = smov 0   ;;  %s1912_s26 = smov 0  }
   0x6   :  { %s1914_s27 = smov 0   ;;  %s1916_s28 = smov 0  }
   0x7 LB: > { %2765 = sst [smem:[#allocation5_spill]] %s1851_s26  ;;  %s1425_s29 = sadd.s32 4294967295, %s1859_s28   ;;  %s1859_s28 = sphi %s1916_s28, %s19_s28   ;;  %s1855_s27 = sphi %s1914_s27, %s2780_s27   ;;  %s1851_s26 = sphi %s1912_s26, %s2779_s26   ;;  %s1847_s25 = sphi %s1910_s25, %s2778_s25   ;;  %s1843_s24 = sphi %s1908_s24, %s2777_s24   ;;  %s1839_s23 = sphi %s1906_s23, %s2783_s23   ;;  %s1835_s22 = sphi %s1904_s22, %s2782_s22   ;;  %s1831_s21 = sphi %s1902_s21, %s2781_s21  }
   0x8   : > { %2766 = sst [smem:[#allocation6_spill]] %s1855_s27  ;;  %s1426_s30 = sadd.s32 4294967294, %s1859_s28  }
   0x9   : > { %s28_s7 = sadd.s32 1, %s1851_s26  ;;  %s31_s8 = sadd.s32 1, %s1855_s27 }
   0xa   : > { %p29_p0 = scmp.ge.s32.totalorder %s28_s7, 4  ;;  %p204_p1 = scmp.ne.s32.totalorder %s1839_s23, %s1835_s22 }
   0xb   : > { %p205_p2 = scmp.eq.s32.totalorder %s1425_s29, 7  ;;  %p210_p4 = scmp.ne.s32.totalorder %s1835_s22, %s1831_s21 }
   0xc   : > { %s2785_s7 = smov (%p29_p0, %s28_s7), 0  ;;  %s2787_s8 = smov (!%p29_p0, %s31_s8), %s1855_s27 }
   0xd   : > { %2767 = sst [smem:[#allocation7_spill]] %s2785_s7  ;;  %p1951_p3 = por %p205_p2, %p204_p1 }
   0xe   : > { %p33_p5 = scmp.ge.s32.totalorder %s2787_s8, 2  ;;  %p211_p6 = scmp.eq.s32.totalorder %s1426_s30, 7 }
   0xf   : > { %p1429_p7 = scmp.ge.s32.totalorder %s1859_s28, 1  ;;  %p281_p8 = scmp.lt.s32.totalorder %s1859_s28, 9 }
  0x10   : > { %s2789_s8 = smov (%p33_p5, %s2787_s8), 0  ;;  %p1961_p9 = por %p211_p6, %p210_p4 }
  0x11   : > { %2769 = sst [smem:[#allocation8_spill]] %s2789_s8  ;;  %p282_p10 = pnand %p1429_p7, %p281_p8 }
  0x12   : > { %s191_s11 = ssub.s32 %s1855_s27, %s2789_s8  ;;  %s194_s12 = sadd.s32 1, %s1839_s23 }
  0x13   : > { %p192_p11 = scmp.eq.s32.totalorder %s191_s11, 0  ;;  %285 = sbr.rel (%p282_p10) target bundleno = 424 (0x1a8), region = 44 }
  0x14   : > { %s2761_s14 = sand.u32 (!%p282_p10), 1, %s1835_s22   ;;  %s1430_s15 = sshll.u32 (!%p282_p10), %s1843_s24, 4 }
  0x15   : > { %s1969_s13 = scalar_select %p192_p11, %s1839_s23, %s194_s12  }
  0x16   : > { %s1622_s16 = smul.u32 (!%p282_p10), 48, %s2761_s14  ;;  %p335_p12 = scmp.lt.s32.totalorder (!%p282_p10), %s1430_s15, 63 }
  0x17   : > { %2771 = sst [smem:[#allocation9_spill]] %s1969_s13  ;;  %s1432_s17 = sshll.u32 (!%p282_p10), %s1847_s25, 5 }
  0x18   : > { %s1436_s18 = sshll.u32 (!%p282_p10), %s1847_s25, 1  ;;  %p341_p13 = scmp.lt.s32.totalorder (!%p282_p10), %s1432_s17, 63 }
  0x19   : > { %p353_p0 = scmp.lt.s32.totalorder (!%p282_p10), %s1436_s18, 3  ;;  %s2772_s0 = sld [smem:[#allocation10_spill]] (!%p282_p10) }
  0x1a   : > { %s2791_s15 = smov (!%p335_p12, %s1430_s15), 63  ;;  %s2793_s17 = smov (!%p341_p13, %s1432_s17), 63 }
  0x1b   : > { %s1431_s19 = sshll.u32 %s2791_s15, 3  ;;  %s1433_s11 = sshll.u32 %s2793_s17, 3 }
  0x1c   : > { %s1985_s7 = scalar_lea.vmem %s2754_s1, %s1433_s11  ;;  %s1990_s26 = scalar_lea.vmem %s2755_s2, %s1431_s19 }
  0x1d   : > { %s2795_s18 = smov (!%p353_p0, %s1436_s18), 3  ;;  %s1997_s20 = scalar_lea.vmem %s2757_s4, %s1431_s19 }
  0x1e   : > { %s355_s8 = scalar_lea.vmem %s2756_s3, %s2795_s18  ;;  %s2007_s27 = scalar_lea.vmem [#allocation2], %s1622_s16 }
  0x1f   : > { %s1980_s30 = scalar_lea.vmem %s2772_s0, %s1431_s19  ;;  %s366_s0 = scalar_lea.vmem %s2758_s5, %s2795_s18 }
  0x20   : > { %p1440_p1 = scmp.ne.s32.totalorder %s1843_s24, 0 }
  0x21   : > { %v1861_v0 = vmov (!%p1440_p1), 0.0  }
  0x22   : > { %372 = sbr.rel (%p1440_p1) target bundleno = 41 (0x29), region = 48  ;;  %373 = vst [vmem:[%s2007_s27] sm:$0xff] (!%p1440_p1), %v1861_v0  ;;  %374 = vst [vmem:[%s2007_s27 + $0x8] sm:$0xff] (!%p1440_p1), %v1861_v0 }
  0x23   : > { %375 = vst [vmem:[%s2007_s27 + $0x10] sm:$0xff] (!%p1440_p1), %v1861_v0  ;;  %376 = vst [vmem:[%s2007_s27 + $0x18] sm:$0xff] (!%p1440_p1), %v1861_v0 }
  0x24   : > { %377 = vst [vmem:[%s2007_s27 + $0x20] sm:$0xff] (!%p1440_p1), %v1861_v0  ;;  %378 = vst [vmem:[%s2007_s27 + $0x28] sm:$0xff] (!%p1440_p1), %v1861_v0 }
  0x29 PF: > { %v411_v1 = vld [vmem:[%s1985_s7 + $0x80] sm:$0xff]  ;;  %v412_v2 = vld [vmem:[%s1985_s7 + $0x88] sm:$0xff]  ;;  %vm427_vm0 = vcmask 261120   ;;  %v413_v7 = vld [vmem:[%s1985_s7 + $0x90] sm:$0xff]  ;;  %v1862_v8 = vmov 0   ;;  %s1298_s14 = sshll.u32 %s2007_s27, 4  ;;  %s2694_s14 = int_to_ptr.vmem [resolvable:$true] %s1298_s14 }
  0x2a   : > { %v395_v3 = vld [vmem:[%s1985_s7] sm:$0xff]  ;;  %v1558_v4 = vpack.c.bf16 %v412_v2, %v411_v1  ;;  %vm2021_vm1 = vmpackc.low %vm427_vm0, %vm427_vm0  ;;  %v396_v6 = vld [vmem:[%s1985_s7 + $0x8] sm:$0xff]  ;;  %1699 = vset.pattern.permute.xlu0 %v1862_v8  ;;  %1700 = vset.pattern.permute.xlu1 %v1862_v8  ;;  %s2775_s19 = sand.u32 1, %s1835_s22   ;;  %s1765_s15 = scalar_lea.vmem %s2694_s14, 768 }
  0x2b   : > { %v1561_v9 = vpack.c.bf16 %v396_v6, %v395_v3  ;;  %v414_v10 = vld [vmem:[%s1985_s7 + $0x98] sm:$0xff]  ;;  %v397_v12 = vld [vmem:[%s1985_s7 + $0x10] sm:$0xff]  ;;  %v415_v14 = vld [vmem:[%s1985_s7 + $0xa0] sm:$0xff]  ;;  %p1766_p2 = scmp.ne.s32.totalorder %s2694_s14, %s1765_s15 }
  0x2c   : > { %1560 = vmatprep.subr.msk.bf16.mxu0 %vm2021_vm1, %v1558_v4  ;;  %1606 = vmatprep.subr.msk.bf16.mxu1 %vm2021_vm1, %v1558_v4  ;;  %v1564_v11 = vpack.c.bf16 %v414_v10, %v413_v7  ;;  %v398_v13 = vld [vmem:[%s1985_s7 + $0x18] sm:$0xff]  ;;  %v416_v15 = vld [vmem:[%s1985_s7 + $0xa8] sm:$0xff]  ;;  %v2045_v18 = vld [vmem:[%s1980_s30] sm:$0xff] }
  0x2d   : > { %1563 = vmatpush3.bf16.xpose.msk.msra.mxu0 %vm2021_vm1, %v1561_v9  ;;  %1614 = vmatpush3.bf16.xpose.msk.msra.mxu1 %vm2021_vm1, %v1561_v9  ;;  %v1567_v16 = vpack.c.bf16 %v398_v13, %v397_v12  ;;  %v1570_v17 = vpack.c.bf16 %v416_v15, %v415_v14  ;;  %v2048_v19 = vld [vmem:[%s1980_s30 + $0x40] sm:$0xff]  ;;  %v400_v21 = vld [vmem:[%s1985_s7 + $0x28] sm:$0xff]  ;;  %v417_v22 = vld [vmem:[%s1985_s7 + $0xb0] sm:$0xff]  ;;  %p1767_p4 = pnand %p1766_p2, %p1951_p3 }
  0x2e   : > { %1566 = vmatprep.subr.msk.bf16.mxu0 %vm2021_vm1, %v1564_v11  ;;  %1607 = vmatprep.subr.msk.bf16.mxu1 %vm2021_vm1, %v1564_v11  ;;  %v399_v20 = vld [vmem:[%s1985_s7 + $0x20] sm:$0xff]  ;;  %v418_v23 = vld [vmem:[%s1985_s7 + $0xb8] sm:$0xff]  ;;  %v786_v26 = vld [vmem:[%s1990_s26 + $0x8] sm:$0xff] }
  0x2f   : > { %1526 = vmatprep.mubr.msk.f32.mxu0 %vm427_vm0, %v2045_v18  ;;  %1542 = vmatprep.mubr.msk.f32.mxu1 %vm427_vm0, %v2048_v19  ;;  %v754_v24 = vld [vmem:[%s1990_s26] sm:$0xff]  ;;  %v1573_v25 = vpack.c.bf16 %v400_v21, %v399_v20  ;;  %v1576_v27 = vpack.c.bf16 %v418_v23, %v417_v22  ;;  %v818_v29 = vld [vmem:[%s1990_s26 + $0x10] sm:$0xff]  ;;  %v402_v31 = vld [vmem:[%s1985_s7 + $0x38] sm:$0xff]  ;;  %p1768_p5 = pneg %p1767_p4 }
  0x30   : > { %757 = vperm.xlu0 %1699, %v754_v24   ;;  %789 = vperm.xlu1 %1700, %v786_v26   ;;  %v776_v28 = vld [vmem:[%s1997_s20] sm:$0xff]  ;;  %v401_v30 = vld [vmem:[%s1985_s7 + $0x30] sm:$0xff]  ;;  %v420_v33 = vld [vmem:[%s1985_s7 + $0xc8] sm:$0xff] }
  0x31   : > { %v419_v32 = vld [vmem:[%s1985_s7 + $0xc0] sm:$0xff]  ;;  %v850_v34 = vld [vmem:[%s1990_s26 + $0x18] sm:$0xff]  ;;  %v1579_v36 = vpack.c.bf16 %v402_v31, %v401_v30  ;;  %v914_v38 = vld [vmem:[%s1990_s26 + $0x28] sm:$0xff] }
  0x32   : > { %v882_v35 = vld [vmem:[%s1990_s26 + $0x20] sm:$0xff]  ;;  %v1582_v37 = vpack.c.bf16 %v420_v33, %v419_v32  ;;  %v946_v39 = vld [vmem:[%s1990_s26 + $0x30] sm:$0xff]  ;;  %v404_v41 = vld [vmem:[%s1985_s7 + $0x48] sm:$0xff] }
  0x33   : > { %v403_v40 = vld [vmem:[%s1985_s7 + $0x40] sm:$0xff]  ;;  %v421_v42 = vld [vmem:[%s1985_s7 + $0xd0] sm:$0xff]  ;;  %v422_v43 = vld [vmem:[%s1985_s7 + $0xd8] sm:$0xff] }
  0x34   : > { %778 = vperm.xlu0 %1699, %v776_v28   ;;  %821 = vperm.xlu1 %1700, %v818_v29   ;;  %v978_v44 = vld [vmem:[%s1990_s26 + $0x38] sm:$0xff]  ;;  %v1010_v45 = vld [vmem:[%s1990_s26 + $0x40] sm:$0xff]  ;;  %v1585_v46 = vpack.c.bf16 %v404_v41, %v403_v40  ;;  %v1588_v47 = vpack.c.bf16 %v422_v43, %v421_v42  ;;  %v1042_v48 = vld [vmem:[%s1990_s26 + $0x48] sm:$0xff] }
  0x35   : > { %1569 = vmatpush3.bf16.xpose.msk.msra.mxu0 %vm2021_vm1, %v1567_v16  ;;  %1615 = vmatpush3.bf16.xpose.msk.msra.mxu1 %vm2021_vm1, %v1567_v16  ;;  %v1074_v49 = vld [vmem:[%s1990_s26 + $0x50] sm:$0xff]  ;;  %v406_v51 = vld [vmem:[%s1985_s7 + $0x58] sm:$0xff]  ;;  %v423_v52 = vld [vmem:[%s1985_s7 + $0xe0] sm:$0xff] }
  0x36   : > { %1572 = vmatprep.subr.msk.bf16.mxu0 %vm2021_vm1, %v1570_v17  ;;  %1608 = vmatprep.subr.msk.bf16.mxu1 %vm2021_vm1, %v1570_v17  ;;  %v405_v50 = vld [vmem:[%s1985_s7 + $0x50] sm:$0xff]  ;;  %v424_v53 = vld [vmem:[%s1985_s7 + $0xe8] sm:$0xff]  ;;  %v1106_v55 = vld [vmem:[%s1990_s26 + $0x58] sm:$0xff] }
  0x37   : > { %v808_v54 = vld [vmem:[%s1997_s20 + $0x8] sm:$0xff]  ;;  %v1591_v56 = vpack.c.bf16 %v406_v51, %v405_v50  ;;  %v1594_v57 = vpack.c.bf16 %v424_v53, %v423_v52  ;;  %v840_v58 = vld [vmem:[%s1997_s20 + $0x10] sm:$0xff]  ;;  %v1138_v59 = vld [vmem:[%s1990_s26 + $0x60] sm:$0xff] }
  0x38   : > { %853 = vperm.xlu0 %1699, %v850_v34   ;;  %885 = vperm.xlu1 %1700, %v882_v35   ;;  %v407_v60 = vld [vmem:[%s1985_s7 + $0x60] sm:$0xff]  ;;  %v408_v61 = vld [vmem:[%s1985_s7 + $0x68] sm:$0xff]  ;;  %v425_v62 = vld [vmem:[%s1985_s7 + $0xf0] sm:$0xff] }
  0x39   : > { %v426_v63 = vld [vmem:[%s1985_s7 + $0xf8] sm:$0xff]  ;;  %v1170_v1 = vld [vmem:[%s1990_s26 + $0x68] sm:$0xff]  ;;  %v1597_v2 = vpack.c.bf16 %v408_v61, %v407_v60  ;;  %v904_v4 = vld [vmem:[%s1997_s20 + $0x20] sm:$0xff] }
  0x3a   : > { %v872_v0 = vld [vmem:[%s1997_s20 + $0x18] sm:$0xff]  ;;  %v1600_v3 = vpack.c.bf16 %v426_v63, %v425_v62  ;;  %v1202_v6 = vld [vmem:[%s1990_s26 + $0x70] sm:$0xff]  ;;  %v936_v9 = vld [vmem:[%s1997_s20 + $0x28] sm:$0xff] }
  0x3b   : > { %v409_v7 = vld [vmem:[%s1985_s7 + $0x70] sm:$0xff]  ;;  %v410_v8 = vld [vmem:[%s1985_s7 + $0x78] sm:$0xff]  ;;  %v1032_v14 = vld [vmem:[%s1997_s20 + $0x40] sm:$0xff] }
  0x3c   : > { %917 = vperm.xlu0 %1699, %v914_v38   ;;  %949 = vperm.xlu1 %1700, %v946_v39   ;;  %v1234_v10 = vld [vmem:[%s1990_s26 + $0x78] sm:$0xff]  ;;  %v1603_v11 = vpack.c.bf16 %v410_v8, %v409_v7  ;;  %v968_v12 = vld [vmem:[%s1997_s20 + $0x30] sm:$0xff]  ;;  %v1064_v15 = vld [vmem:[%s1997_s20 + $0x48] sm:$0xff] }
  0x3d   : > { %1575 = vmatpush3.bf16.xpose.msk.msra.mxu0 %vm2021_vm1, %v1573_v25  ;;  %1616 = vmatpush3.bf16.xpose.msk.msra.mxu1 %vm2021_vm1, %v1573_v25  ;;  %v1000_v13 = vld [vmem:[%s1997_s20 + $0x38] sm:$0xff]  ;;  %v380_v16 = vld [vmem:[%s1980_s30 + $0x8] sm:$0xff]  ;;  %v1096_v5 = vld [vmem:[%s1997_s20 + $0x50] sm:$0xff] }
  0x3e   : > { %1578 = vmatprep.subr.msk.bf16.mxu0 %vm2021_vm1, %v1576_v27  ;;  %1609 = vmatprep.subr.msk.bf16.mxu1 %vm2021_vm1, %v1576_v27  ;;  %v388_v17 = vld [vmem:[%s1980_s30 + $0x48] sm:$0xff]  ;;  %v1128_v20 = vld [vmem:[%s1997_s20 + $0x58] sm:$0xff]  ;;  %v381_v21 = vld [vmem:[%s1980_s30 + $0x10] sm:$0xff] }
  0x3f   : > { %v389_v22 = vld [vmem:[%s1980_s30 + $0x50] sm:$0xff]  ;;  %v382_v23 = vld [vmem:[%s1980_s30 + $0x18] sm:$0xff]  ;;  %v383_v27 = vld [vmem:[%s1980_s30 + $0x20] sm:$0xff] }
  0x40   : > { %981 = vperm.xlu0 %1699, %v978_v44   ;;  %1013 = vperm.xlu1 %1700, %v1010_v45   ;;  %v390_v24 = vld [vmem:[%s1980_s30 + $0x58] sm:$0xff]  ;;  %v1224_v25 = vld [vmem:[%s1997_s20 + $0x70] sm:$0xff]  ;;  %v391_v28 = vld [vmem:[%s1980_s30 + $0x60] sm:$0xff]  ;;  %v735_v44 = vlaneseq }
  0x41   : > { %v1256_v26 = vld [vmem:[%s1997_s20 + $0x78] sm:$0xff]  ;;  %v384_v29 = vld [vmem:[%s1980_s30 + $0x28] sm:$0xff]  ;;  %v385_v31 = vld [vmem:[%s1980_s30 + $0x30] sm:$0xff] }
  0x42   : > { %v392_v30 = vld [vmem:[%s1980_s30 + $0x68] sm:$0xff]  ;;  %v393_v32 = vld [vmem:[%s1980_s30 + $0x70] sm:$0xff]  ;;  %v386_v33 = vld [vmem:[%s1980_s30 + $0x38] sm:$0xff]  ;;  %v736_v45 = vshrl.u32 %v735_v44, 7 }
  0x43   : > { %v394_v34 = vld [vmem:[%s1980_s30 + $0x78] sm:$0xff]  ;;  %v745_v62 = vld [vmem:[%s366_s0] sm:$0x3]  ;;  %s1493_s0 = sshll.u32 %s1847_s25, 8  ;;  %s2701_s30 = scalar_lea.sflag [#allocation3], %s2775_s19 }
  0x44   : > { %1045 = vperm.xlu0 %1699, %v1042_v48   ;;  %1077 = vperm.xlu1 %1700, %v1074_v49   ;;  %v737_v48 = vsub.s32 0, %v736_v45  ;;  %v733_v49 = vld [vmem:[%s355_s8] sm:$0x3]  ;;  %v741_v50 = vsub.s32 1, %v736_v45  ;;  %s2692_s18 = scalar_lea.hbm %s2759_s6, %s1493_s0 }
  0x45   : > { %1581 = vmatpush3.bf16.xpose.msk.msra.mxu0 %vm2021_vm1, %v1579_v36  ;;  %1617 = vmatpush3.bf16.xpose.msk.msra.mxu1 %vm2021_vm1, %v1579_v36 }
  0x46   : > { %1584 = vmatprep.subr.msk.bf16.mxu0 %vm2021_vm1, %v1582_v37  ;;  %1610 = vmatprep.subr.msk.bf16.mxu1 %vm2021_vm1, %v1582_v37  ;;  %v2221_v53 = vrot.slane %v733_v49, %v737_v48 }
  0x48   : > { %810 = vperm.xlu0 %1699, %v808_v54   ;;  %1109 = vperm.xlu1 %1700, %v1106_v55   ;;  %v2223_v54 = vrot.slane %v733_v49, %v741_v50 }
  0x4c   : > { %842 = vperm.xlu0 %1699, %v840_v58   ;;  %1141 = vperm.xlu1 %1700, %v1138_v59  }
  0x4d   : > { %1587 = vmatpush3.bf16.xpose.msk.msra.mxu0 %vm2021_vm1, %v1585_v46  ;;  %1618 = vmatpush3.bf16.xpose.msk.msra.mxu1 %vm2021_vm1, %v1585_v46 }
  0x4e   : > { %1590 = vmatprep.subr.msk.bf16.mxu0 %vm2021_vm1, %v1588_v47  ;;  %1611 = vmatprep.subr.msk.bf16.mxu1 %vm2021_vm1, %v1588_v47 }
  0x50   : > { %874 = vperm.xlu0 %1699, %v872_v0   ;;  %1173 = vperm.xlu1 %1700, %v1170_v1  }
  0x54   : > { %906 = vperm.xlu0 %1699, %v904_v4   ;;  %1205 = vperm.xlu1 %1700, %v1202_v6  }
  0x55   : > { %1593 = vmatpush3.bf16.xpose.msk.msra.mxu0 %vm2021_vm1, %v1591_v56  ;;  %1619 = vmatpush3.bf16.xpose.msk.msra.mxu1 %vm2021_vm1, %v1591_v56 }
  0x56   : > { %1596 = vmatprep.subr.msk.bf16.mxu0 %vm2021_vm1, %v1594_v57  ;;  %1612 = vmatprep.subr.msk.bf16.mxu1 %vm2021_vm1, %v1594_v57 }
  0x58   : > { %938 = vperm.xlu0 %1699, %v936_v9   ;;  %1237 = vperm.xlu1 %1700, %v1234_v10   ;;  %v2243_v9 = vrot.slane %v745_v62, %v737_v48  ;;  %v2245_v10 = vrot.slane %v745_v62, %v741_v50 }
  0x5c   : > { %970 = vperm.xlu0 %1699, %v968_v12   ;;  %1002 = vperm.xlu1 %1700, %v1000_v13  }
  0x5d   : > { %1599 = vmatpush3.bf16.xpose.msk.msra.mxu0 %vm2021_vm1, %v1597_v2  ;;  %1620 = vmatpush3.bf16.xpose.msk.msra.mxu1 %vm2021_vm1, %v1597_v2 }
  0x5e   : > { %1602 = vmatprep.subr.msk.bf16.mxu0 %vm2021_vm1, %v1600_v3  ;;  %1613 = vmatprep.subr.msk.bf16.mxu1 %vm2021_vm1, %v1600_v3 }
  0x60   : > { %1034 = vperm.xlu0 %1699, %v1032_v14   ;;  %1066 = vperm.xlu1 %1700, %v1064_v15  }
  0x64   : > { %1098 = vperm.xlu0 %1699, %v1096_v5   ;;  %1130 = vperm.xlu1 %1700, %v1128_v20  }
  0x65   : > { %1605 = vmatpush3.bf16.xpose.msk.msra.mxu0 %vm2021_vm1, %v1603_v11  ;;  %1621 = vmatpush3.bf16.xpose.msk.msra.mxu1 %vm2021_vm1, %v1603_v11 }
  0x6c   : > { %1527 = vmatmul.mubr.msk.f32.vlgmr.msra.gmra.mrb[0].mxu0 %vm427_vm0, %v2045_v18  ;;  %1543 = vmatmul.mubr.msk.f32.vlgmr.msra.gmra.mrb[0].mxu1 %vm427_vm0, %v2048_v19  ;;  %v1160_v18 = vld [vmem:[%s1997_s20 + $0x60] sm:$0xff]  ;;  %v1192_v19 = vld [vmem:[%s1997_s20 + $0x68] sm:$0xff]  ;;  %s1863_s20 = smov [#allocation2]  }
  0x6d   : > { %1528 = vmatprep.mubr.msk.f32.mxu0 %vm427_vm0, %v380_v16  ;;  %1544 = vmatprep.mubr.msk.f32.mxu1 %vm427_vm0, %v388_v17  ;;  %s1769_s17 = sshll.u32 %s1863_s20, 4  ;;  %s1770_s17 = int_to_ptr.vmem [resolvable:$false] %s1769_s17 }
  0x6e   : > { %1162 = vperm.xlu0 %1699, %v1160_v18   ;;  %1194 = vperm.xlu1 %1700, %v1192_v19   ;;  %s1771_s29 = scalar_lea.vmem %s1770_s17, 1536  ;;  %p1772_p6 = scmp.lt.s32.totalorder %s2694_s14, %s1770_s17 }
  0x6f   : > { %p1773_p7 = scmp.lt.s32.totalorder %s1771_s29, %s1765_s15 }
  0x70   : > { %1529 = vmatmul.mubr.msk.f32.gmra.mrb[2].mxu0 %vm427_vm0, %v380_v16  ;;  %1545 = vmatmul.mubr.msk.f32.gmra.mrb[2].mxu1 %vm427_vm0, %v388_v17 }
  0x71   : > { %1530 = vmatprep.mubr.msk.f32.mxu0 %vm427_vm0, %v381_v21  ;;  %1546 = vmatprep.mubr.msk.f32.mxu1 %vm427_vm0, %v389_v22  ;;  %p1774_p8 = por %p1773_p7, %p1772_p6 }
  0x72   : > { %1226 = vperm.xlu0 %1699, %v1224_v25   ;;  %1258 = vperm.xlu1 %1700, %v1256_v26  }
  0x73   : > { %p1775_p10 = pnand %p1774_p8, %p1768_p5 }
  0x74   : > { %1531 = vmatmul.mubr.msk.f32.gmra.mrb[4].mxu0 %vm427_vm0, %v381_v21  ;;  %1547 = vmatmul.mubr.msk.f32.gmra.mrb[4].mxu1 %vm427_vm0, %v389_v22 }
  0x75   : > { %1532 = vmatprep.mubr.msk.f32.mxu0 %vm427_vm0, %v382_v23  ;;  %1548 = vmatprep.mubr.msk.f32.mxu1 %vm427_vm0, %v390_v24 }
  0x78   : > { %1533 = vmatmul.mubr.msk.f32.gmra.mrb[6].mxu0 %vm427_vm0, %v382_v23  ;;  %1549 = vmatmul.mubr.msk.f32.gmra.mrb[6].mxu1 %vm427_vm0, %v390_v24 }
  0x79   : > { %1534 = vmatprep.mubr.msk.f32.mxu0 %vm427_vm0, %v383_v27  ;;  %1550 = vmatprep.mubr.msk.f32.mxu1 %vm427_vm0, %v391_v28 }
  0x7c   : > { %1535 = vmatmul.mubr.msk.f32.gmra.mrb[8].mxu0 %vm427_vm0, %v383_v27  ;;  %1551 = vmatmul.mubr.msk.f32.gmra.mrb[8].mxu1 %vm427_vm0, %v391_v28 }
  0x7d   : > { %1536 = vmatprep.mubr.msk.f32.mxu0 %vm427_vm0, %v384_v29  ;;  %1552 = vmatprep.mubr.msk.f32.mxu1 %vm427_vm0, %v392_v30 }
  0x80   : > { %1537 = vmatmul.mubr.msk.f32.gmra.mrb[10].mxu0 %vm427_vm0, %v384_v29  ;;  %1553 = vmatmul.mubr.msk.f32.gmra.mrb[10].mxu1 %vm427_vm0, %v392_v30 }
  0x81   : > { %1538 = vmatprep.mubr.msk.f32.mxu0 %vm427_vm0, %v385_v31  ;;  %1554 = vmatprep.mubr.msk.f32.mxu1 %vm427_vm0, %v393_v32 }
  0x84   : > { %1539 = vmatmul.mubr.msk.f32.gmra.mrb[12].mxu0 %vm427_vm0, %v385_v31  ;;  %1555 = vmatmul.mubr.msk.f32.gmra.mrb[12].mxu1 %vm427_vm0, %v393_v32 }
  0x85   : > { %1540 = vmatprep.mubr.msk.f32.mxu0 %vm427_vm0, %v386_v33  ;;  %1556 = vmatprep.mubr.msk.f32.mxu1 %vm427_vm0, %v394_v34 }
  0x88   : > { %1541 = vmatmul.mubr.msk.f32.gmra.mrb[14].mxu0 %vm427_vm0, %v386_v33  ;;  %1557 = vmatmul.mubr.msk.f32.gmra.mrb[14].mxu1 %vm427_vm0, %v394_v34 }
  0xaf   : > { %v758_v35 = vpop.permute.xlu0 %757  ;;  %v790_v36 = vpop.permute.xlu1 %789 }
  0xb0   : > { %v760_v55 = vadd.f32 %v758_v35, %v2221_v53  ;;  %v761_v58 = vadd.f32 %v758_v35, %v2223_v54  ;;  %v792_v61 = vadd.f32 %v790_v36, %v2221_v53  ;;  %v793_v2 = vadd.f32 %v790_v36, %v2223_v54 }
  0xb3   : > { %v2206_v37 = vpop.permute.xlu0 %778  ;;  %v822_v38 = vpop.permute.xlu1 %821 }
  0xb4   : > { %v824_v14 = vadd.f32 %v822_v38, %v2221_v53  ;;  %v825_v15 = vadd.f32 %v822_v38, %v2223_v54  ;;  %vm780_vm2 = vcmp.eq.s32.totalorder %v2206_v37, %v2243_v9  ;;  %vm781_vm3 = vcmp.eq.s32.totalorder %v2206_v37, %v2245_v10 }
  0xb7   : > { %v854_v39 = vpop.permute.xlu0 %853  ;;  %v886_v40 = vpop.permute.xlu1 %885 }
  0xb8   : > { %v856_v21 = vadd.f32 %v854_v39, %v2221_v53  ;;  %v857_v22 = vadd.f32 %v854_v39, %v2223_v54  ;;  %v2252_v23 = vadd.f32 %v886_v40, %v2221_v53  ;;  %v2255_v24 = vadd.f32 %v886_v40, %v2223_v54 }
  0xbb   : > { %v918_v41 = vpop.permute.xlu0 %917  ;;  %v950_v42 = vpop.permute.xlu1 %949 }
  0xbc   : > { %v2258_v27 = vadd.f32 %v918_v41, %v2221_v53  ;;  %v2264_v32 = vadd.f32 %v918_v41, %v2223_v54  ;;  %v2267_v33 = vadd.f32 %v950_v42, %v2221_v53  ;;  %v2272_v39 = vadd.f32 %v950_v42, %v2223_v54 }
  0xbf   : > { %v2208_v43 = vpop.permute.xlu0 %981  ;;  %v1014_v46 = vpop.permute.xlu1 %1013 }
  0xc0   : > { %v1016_v4 = vadd.f32 %v1014_v46, %v2221_v53  ;;  %v1017_v28 = vadd.f32 %v1014_v46, %v2223_v54  ;;  %v2276_v40 = vadd.f32 %v2208_v43, %v2221_v53  ;;  %v2284_v42 = vadd.f32 %v2208_v43, %v2223_v54 }
  0xc3   : > { %v2210_v47 = vpop.permute.xlu0 %1045  ;;  %v2217_v51 = vpop.permute.xlu1 %1077 }
  0xc4   : > { %v1048_v50 = vadd.f32 %v2210_v47, %v2221_v53  ;;  %v2300_v43 = vadd.f32 %v2217_v51, %v2223_v54 }
  0xc7   : > { %v2219_v52 = vpop.permute.xlu0 %810  ;;  %v2226_v56 = vpop.permute.xlu1 %1109 }
  0xc8   : > { %vm812_vm4 = vcmp.eq.s32.totalorder %v2219_v52, %v2243_v9  ;;  %vm813_vm5 = vcmp.eq.s32.totalorder %v2219_v52, %v2245_v10 }
  0xcb   : > { %v2228_v57 = vpop.permute.xlu0 %842  ;;  %v2239_v6 = vpop.permute.xlu1 %1141 }
  0xcc   : > { %vm844_vm6 = vcmp.eq.s32.totalorder %v2228_v57, %v2243_v9  ;;  %vm845_vm7 = vcmp.eq.s32.totalorder %v2228_v57, %v2245_v10 }
  0xcf   : > { %v2241_v7 = vpop.permute.xlu0 %874  ;;  %v1174_v45 = vpop.permute.xlu1 %1173 }
  0xd0   : > { %vm876_vm8 = vcmp.eq.s32.totalorder %v2241_v7, %v2243_v9  ;;  %vm877_vm9 = vcmp.eq.s32.totalorder %v2241_v7, %v2245_v10 }
  0xd3   : > { %v2278_v41 = vpop.permute.xlu0 %906 }
  0xd4   : > { %vm908_vm10 = vcmp.eq.s32.totalorder %v2278_v41, %v2243_v9  ;;  %vm909_vm13 = vcmp.eq.s32.totalorder %v2278_v41, %v2245_v10 }
 0x13f   : > { %v638_v59 = vpop.f32.mrb[0].mxu0  ;;  %v686_v60 = vpop.f32.mrb[0].mxu1 }
 0x140   : > { %v762_v63 = vadd.f32 %v760_v55, %v638_v59  ;;  %v640_v0 = vpop.f32.mrb[1].mxu0  ;;  %v688_v1 = vpop.f32.mrb[1].mxu1  ;;  %v1018_v25 = vadd.f32 %v1016_v4, %v686_v60  ;;  %v1049_v55 = vadd.f32 %v2210_v47, %v2223_v54  ;;  %v2306_v47 = vadd.f32 %v2226_v56, %v2221_v53 }
 0x141   : > { %v763_v3 = vadd.f32 %v761_v58, %v640_v0  ;;  %v1019_v58 = vadd.f32 %v1017_v28, %v688_v1 }
 0x142   : > { %v764_v8 = vmin.f32 %v762_v63, 0.0  ;;  %v1020_v46 = vmin.f32 %v1018_v25, 0.0  ;;  %v2336_v25 = vadd.f32 %v1174_v45, %v2223_v54 }
 0x143   : > { %v765_v11 = vmin.f32 %v763_v3, 0.0  ;;  %v644_v12 = vpop.f32.mrb[2].mxu0  ;;  %v692_v13 = vpop.f32.mrb[2].mxu1 }
 0x144   : > { %v766_v16 = vmul.f32 1.442695, %v764_v8  ;;  %v794_v17 = vadd.f32 %v792_v61, %v644_v12  ;;  %v646_v5 = vpop.f32.mrb[3].mxu0  ;;  %v694_v20 = vpop.f32.mrb[3].mxu1  ;;  %v1080_v61 = vadd.f32 %v2217_v51, %v2221_v53  ;;  %v1022_v3 = vmul.f32 1.442695, %v1020_v46 }
 0x145   : > { %v768_v18 = vmul.f32 1.442695, %v765_v11  ;;  %v795_v19 = vadd.f32 %v793_v2, %v646_v5  ;;  %v2312_v11 = vadd.f32 %v2226_v56, %v2223_v54  ;;  %v1021_v51 = vmin.f32 %v1019_v58, 0.0 }
 0x146   : > { %v796_v26 = vmin.f32 %v794_v17, 0.0  ;;  %1701 = vpow2.f32 %v766_v16  ;;  %v1050_v12 = vadd.f32 %v1048_v50, %v692_v13  ;;  %v2320_v17 = vadd.f32 %v2239_v6, %v2221_v53 }
 0x147   : > { %v797_v29 = vmin.f32 %v795_v19, 0.0  ;;  %v650_v30 = vpop.f32.mrb[4].mxu0  ;;  %v2261_v31 = vpop.f32.mrb[4].mxu1  ;;  %1703 = vpow2.f32 %v768_v18  ;;  %v2322_v5 = vadd.f32 %v1049_v55, %v694_v20  ;;  %v2330_v18 = vadd.f32 %v2239_v6, %v2223_v54 }
 0x148   : > { %v798_v34 = vmul.f32 1.442695, %v796_v26  ;;  %v826_v35 = vadd.f32 %v824_v14, %v650_v30  ;;  %v652_v36 = vpop.f32.mrb[5].mxu0  ;;  %v2269_v38 = vpop.f32.mrb[5].mxu1  ;;  %v2333_v19 = vadd.f32 %v1174_v45, %v2221_v53 }
 0x149   : > { %v800_v44 = vmul.f32 1.442695, %v797_v29  ;;  %v827_v49 = vadd.f32 %v825_v15, %v652_v36  ;;  %v1206_v26 = vpop.permute.xlu1 %1205  ;;  %v2343_v29 = vpop.permute.xlu0 %938  ;;  %v1024_v36 = vmul.f32 1.442695, %v1021_v51  ;;  %v1053_v55 = vmin.f32 %v2322_v5, 0.0 }
 0x14a   : > { %1705 = vpow2.f32 %v798_v34  ;;  %v828_v48 = vmin.f32 %v826_v35, 0.0  ;;  %v2341_v28 = vadd.f32 %v1206_v26, %v2221_v53  ;;  %v2347_v35 = vadd.f32 %v1206_v26, %v2223_v54 }
 0x14b   : > { %v656_v59 = vpop.f32.mrb[6].mxu0  ;;  %v2290_v60 = vpop.f32.mrb[6].mxu1  ;;  %1707 = vpow2.f32 %v800_v44  ;;  %v829_v63 = vmin.f32 %v827_v49, 0.0  ;;  %v1052_v44 = vmin.f32 %v1050_v12, 0.0  ;;  %v1083_v26 = vadd.f32 %v2300_v43, %v2269_v38 }
 0x14c   : > { %v830_v62 = vmul.f32 1.442695, %v828_v48  ;;  %v658_v0 = vpop.f32.mrb[7].mxu0  ;;  %v2294_v2 = vpop.f32.mrb[7].mxu1  ;;  %v858_v1 = vadd.f32 %v856_v21, %v656_v59  ;;  %v1114_v38 = vadd.f32 %v2306_v47, %v2290_v60  ;;  %vm940_vm15 = vcmp.eq.s32.totalorder %v2343_v29, %v2243_v9 }
 0x14d   : > { %v832_v4 = vmul.f32 1.442695, %v829_v63  ;;  %v859_v8 = vadd.f32 %v857_v22, %v658_v0  ;;  %v1054_v37 = vmul.f32 1.442695, %v1052_v44  ;;  %v1085_v57 = vmin.f32 %v1083_v26, 0.0 }
 0x14e   : > { %1709 = vpow2.f32 %v830_v62  ;;  %v860_v14 = vmin.f32 %v858_v1, 0.0  ;;  %vm941_vm0 = vcmp.eq.s32.totalorder %v2343_v29, %v2245_v10 }
 0x14f   : > { %v662_v15 = vpop.f32.mrb[8].mxu0  ;;  %v2314_v16 = vpop.f32.mrb[8].mxu1  ;;  %1711 = vpow2.f32 %v832_v4  ;;  %v861_v21 = vmin.f32 %v859_v8, 0.0 }
 0x150   : > { %v2324_v22 = vpop.f32.mrb[9].mxu0  ;;  %v2326_v56 = vpop.f32.mrb[9].mxu1  ;;  %v862_v20 = vmul.f32 1.442695, %v860_v14  ;;  %1713 = vpow2.f32 %v1022_v3  ;;  %v890_v6 = vadd.f32 %v2252_v23, %v662_v15  ;;  %v2358_v23 = vadd.f32 %v1080_v61, %v2261_v31 }
 0x151   : > { %v1702_v13 = vpop.eup %1701  ;;  %v864_v30 = vmul.f32 1.442695, %v861_v21 }
 0x152   : > { %v1704_v34 = vpop.eup %1703  ;;  %1715 = vpow2.f32 %v862_v20  ;;  %v772_v49 = vmul.f32 %v1702_v13, %v1702_v13  ;;  %v782_v50 = vsel %vm780_vm2, %v1702_v13, 0.0  ;;  %v892_v4 = vmin.f32 %v890_v6, 0.0 }
 0x153   : > { %v2349_v45 = vpop.f32.mrb[10].mxu0  ;;  %v2351_v46 = vpop.f32.mrb[10].mxu1  ;;  %1717 = vpow2.f32 %v864_v30  ;;  %v773_v3 = vmul.f32 %v1704_v34, %v1704_v34  ;;  %v783_v31 = vsel %vm781_vm3, %v1704_v34, 0.0  ;;  %v1084_v44 = vmin.f32 %v2358_v23, 0.0 }
 0x154   : > { %v1706_v48 = vpop.eup %1705  ;;  %v2360_v58 = vpop.f32.mrb[11].mxu0  ;;  %1719 = vpow2.f32 %v1024_v36  ;;  %v894_v43 = vmul.f32 1.442695, %v892_v4  ;;  %v1056_v23 = vmul.f32 1.442695, %v1053_v55 }
 0x155   : > { %v2362_v59 = vpop.f32.mrb[11].mxu1  ;;  %v802_v62 = vadd.f32 %v1706_v48, %v1702_v13  ;;  %v804_v63 = vmul.f32 %v1706_v48, %v1706_v48  ;;  %v814_v0 = vsel %vm812_vm4, %v1706_v48, 0.0  ;;  %v1708_v1 = vpop.eup %1707  ;;  %v1086_v26 = vmul.f32 1.442695, %v1084_v44 }
 0x156   : > { %v816_v61 = vadd.f32 %v814_v0, %v782_v50  ;;  %v803_v51 = vadd.f32 %v1708_v1, %v1704_v34  ;;  %v805_v12 = vmul.f32 %v1708_v1, %v1708_v1  ;;  %v815_v14 = vsel %vm813_vm5, %v1708_v1, 0.0  ;;  %v1238_v50 = vpop.permute.xlu1 %1237 }
 0x157   : > { %v806_v8 = vadd.f32 %v804_v63, %v772_v49  ;;  %v2377_v15 = vpop.f32.mrb[12].mxu0  ;;  %v2379_v5 = vpop.f32.mrb[12].mxu1  ;;  %v817_v13 = vadd.f32 %v815_v14, %v783_v31  ;;  %1721 = vpow2.f32 %v894_v43  ;;  %v923_v7 = vadd.f32 %v2264_v32, %v2360_v58 }
 0x158   : > { %v1710_v21 = vpop.eup %1709  ;;  %v2383_v20 = vpop.f32.mrb[13].mxu0  ;;  %v807_v6 = vadd.f32 %v805_v12, %v773_v3  ;;  %1723 = vpow2.f32 %v1054_v37 }
 0x159   : > { %v2385_v30 = vpop.f32.mrb[13].mxu1  ;;  %v834_v34 = vadd.f32 %v1710_v21, %v802_v62  ;;  %v836_v48 = vmul.f32 %v1710_v21, %v1710_v21  ;;  %v846_v52 = vsel %vm844_vm6, %v1710_v21, 0.0  ;;  %v1712_v49 = vpop.eup %1711  ;;  %1725 = vpow2.f32 %v1056_v23 }
 0x15a   : > { %v2390_v63 = vpop.permute.xlu0 %970  ;;  %v848_v36 = vadd.f32 %v846_v52, %v816_v61  ;;  %v835_v1 = vadd.f32 %v1712_v49, %v803_v51  ;;  %v837_v3 = vmul.f32 %v1712_v49, %v1712_v49  ;;  %v847_v62 = vsel %vm845_vm7, %v1712_v49, 0.0  ;;  %v2402_v14 = vpop.eup %1713 }
 0x15b   : > { %v838_v0 = vadd.f32 %v836_v48, %v806_v8  ;;  %v2398_v31 = vpop.f32.mrb[14].mxu0  ;;  %v2400_v12 = vpop.f32.mrb[14].mxu1  ;;  %v2405_v61 = vadd.f32 %v1238_v50, %v2221_v53  ;;  %v849_v21 = vadd.f32 %v847_v62, %v817_v13  ;;  %v1115_v51 = vadd.f32 %v2312_v11, %v2294_v2 }
 0x15c   : > { %v2407_v60 = vpop.f32.mrb[15].mxu0  ;;  %v2409_v47 = vpop.f32.mrb[15].mxu1  ;;  %v839_v8 = vadd.f32 %v837_v3, %v807_v6  ;;  %v891_v48 = vadd.f32 %v2255_v24, %v2324_v22  ;;  %v922_v52 = vadd.f32 %v2258_v27, %v2349_v45  ;;  %v1116_v2 = vmin.f32 %v1114_v38, 0.0 }
 0x15d   : > { %v1716_v4 = vpop.eup %1715  ;;  %v1088_v3 = vmul.f32 1.442695, %v1085_v57  ;;  %v1146_v27 = vadd.f32 %v2320_v17, %v2314_v16  ;;  %v1117_v38 = vmin.f32 %v1115_v51, 0.0  ;;  %1727 = vpow2.f32 %v1086_v26 }
 0x15e   : > { %v866_v53 = vadd.f32 %v1716_v4, %v834_v34  ;;  %v868_v55 = vmul.f32 %v1716_v4, %v1716_v4  ;;  %v878_v13 = vsel %vm876_vm8, %v1716_v4, 0.0  ;;  %v1718_v6 = vpop.eup %1717  ;;  %v2427_v34 = vpop.permute.xlu1 %1002  ;;  %v893_v45 = vmin.f32 %v891_v48, 0.0 }
 0x15f   : > { %v880_v49 = vadd.f32 %v878_v13, %v848_v36  ;;  %v2422_v43 = vadd.f32 %v1718_v6, %v835_v1  ;;  %v869_v24 = vmul.f32 %v1718_v6, %v1718_v6  ;;  %v879_v22 = vsel %vm877_vm9, %v1718_v6, 0.0  ;;  %v2433_v37 = vpop.eup %1719  ;;  %v1035_v36 = vpop.permute.xlu0 %1034 }
 0x160   : > { %v870_v11 = vadd.f32 %v868_v55, %v838_v0  ;;  %v2429_v62 = vadd.f32 %v879_v22, %v849_v21  ;;  %v924_v0 = vmin.f32 %v922_v52, 0.0  ;;  %v2440_v1 = vadd.f32 %v1238_v50, %v2223_v54 }
 0x161   : > { %v2435_v44 = vadd.f32 %v869_v24, %v839_v8  ;;  %vm1036_vm11 = vcmp.eq.s32.totalorder %v1035_v36, %v2243_v9  ;;  %v896_v21 = vmul.f32 1.442695, %v893_v45  ;;  %vm1037_vm12 = vcmp.eq.s32.totalorder %v1035_v36, %v2245_v10  ;;  %v1722_v54 = vpop.eup %1721 }
 0x162   : > { %v1118_v16 = vmul.f32 1.442695, %v1116_v2  ;;  %v926_v17 = vmul.f32 1.442695, %v924_v0  ;;  %v925_v4 = vmin.f32 %v923_v7, 0.0  ;;  %v1148_v8 = vmin.f32 %v1146_v27, 0.0  ;;  %v2452_v51 = vpop.permute.xlu1 %1066 }
 0x163   : > { %1729 = vpow2.f32 %v896_v21  ;;  %v954_v57 = vadd.f32 %v2267_v33, %v2377_v15  ;;  %v955_v32 = vadd.f32 %v2272_v39, %v2383_v20  ;;  %v1120_v58 = vmul.f32 1.442695, %v1117_v38  ;;  %v2518_v21 = vpop.permute.xlu0 %1098 }
 0x164   : > { %1731 = vpow2.f32 %v1088_v3  ;;  %v1147_v50 = vadd.f32 %v2330_v18, %v2326_v56  ;;  %v928_v23 = vmul.f32 1.442695, %v925_v4  ;;  %v898_v48 = vadd.f32 %v1722_v54, %v866_v53  ;;  %v2459_v56 = vpop.eup %1723 }
 0x165   : > { %v900_v55 = vmul.f32 %v1722_v54, %v1722_v54  ;;  %v910_v33 = vsel %vm908_vm10, %v1722_v54, 0.0  ;;  %1733 = vpow2.f32 %v926_v17  ;;  %vm1068_vm14 = vcmp.eq.s32.totalorder %v2452_v51, %v2243_v9 }
 0x166   : > { %1735 = vpow2.f32 %v1118_v16  ;;  %v912_v39 = vadd.f32 %v910_v33, %v880_v49  ;;  %v956_v15 = vmin.f32 %v954_v57, 0.0  ;;  %v1150_v20 = vmul.f32 1.442695, %v1148_v8 }
 0x167   : > { %v902_v18 = vadd.f32 %v900_v55, %v870_v11  ;;  %1737 = vpow2.f32 %v928_v23  ;;  %v957_v53 = vmin.f32 %v955_v32, 0.0  ;;  %v1149_v13 = vmin.f32 %v1147_v50, 0.0 }
 0x168   : > { %1739 = vpow2.f32 %v1120_v58  ;;  %v958_v52 = vmul.f32 1.442695, %v956_v15  ;;  %v986_v6 = vadd.f32 %v2276_v40, %v2398_v31  ;;  %v1178_v26 = vadd.f32 %v2333_v19, %v2351_v46 }
 0x169   : > { %v2471_v49 = vadd.f32 %v2336_v25, %v2362_v59  ;;  %v960_v2 = vmul.f32 1.442695, %v957_v53  ;;  %v987_v11 = vadd.f32 %v2284_v42, %v2407_v60  ;;  %vm1069_vm1 = vcmp.eq.s32.totalorder %v2452_v51, %v2245_v10  ;;  %v2490_v25 = vpop.eup %1725 }
 0x16a   : > { %v2479_v40 = vmul.f32 %v2402_v14, %v2402_v14  ;;  %v2484_v31 = vsel %vm1036_vm11, %v2402_v14, 0.0  ;;  %v2488_v19 = vmul.f32 %v2433_v37, %v2433_v37  ;;  %1741 = vpow2.f32 %v958_v52  ;;  %v2497_v60 = vpop.eup %1727 }
 0x16b   : > { %v2495_v42 = vsel %vm1037_vm12, %v2433_v37, 0.0  ;;  %1743 = vpow2.f32 %v1150_v20  ;;  %v988_v46 = vmin.f32 %v986_v6, 0.0  ;;  %v989_v59 = vmin.f32 %v987_v11, 0.0 }
 0x16c   : > { %vm972_vm2 = vcmp.eq.s32.totalorder %v2390_v63, %v2243_v9  ;;  %v2503_v24 = vmul.f32 %v2459_v56, %v2459_v56  ;;  %v2509_v22 = vsel %vm1068_vm14, %v2459_v56, 0.0  ;;  %v1152_v3 = vmul.f32 1.442695, %v1149_v13 }
 0x16d   : > { %1745 = vpow2.f32 %v960_v2  ;;  %v1730_v27 = vpop.eup %1729  ;;  %v1180_v45 = vmin.f32 %v1178_v26, 0.0  ;;  %v1181_v36 = vmin.f32 %v2471_v49, 0.0  ;;  %v1210_v38 = vadd.f32 %v2341_v28, %v2379_v5  ;;  %v2564_v26 = vpop.permute.xlu0 %1162 }
 0x16e   : > { %v990_v0 = vmul.f32 1.442695, %v988_v46  ;;  %v2514_v7 = vpop.eup %1731  ;;  %vm973_vm3 = vcmp.eq.s32.totalorder %v2390_v63, %v2245_v10  ;;  %v899_v16 = vadd.f32 %v1730_v27, %v2422_v43  ;;  %v901_v17 = vmul.f32 %v1730_v27, %v1730_v27 }
 0x16f   : > { %v911_v4 = vsel %vm909_vm13, %v1730_v27, 0.0  ;;  %v1211_v8 = vadd.f32 %v2347_v35, %v2385_v30  ;;  %v1734_v57 = vpop.eup %1733  ;;  %vm1100_vm4 = vcmp.eq.s32.totalorder %v2518_v21, %v2243_v9  ;;  %v1242_v5 = vadd.f32 %v2405_v61, %v2400_v12 }
 0x170   : > { %v913_v28 = vadd.f32 %v911_v4, %v2429_v62  ;;  %1747 = vpow2.f32 %v990_v0  ;;  %v992_v32 = vmul.f32 1.442695, %v989_v59  ;;  %v2531_v43 = vpop.eup %1735  ;;  %v903_v54 = vadd.f32 %v901_v17, %v2435_v44  ;;  %v2539_v62 = vpop.permute.xlu1 %1130 }
 0x171   : > { %v930_v41 = vadd.f32 %v1734_v57, %v898_v48  ;;  %v932_v58 = vmul.f32 %v1734_v57, %v1734_v57  ;;  %v942_v35 = vsel %vm940_vm15, %v1734_v57, 0.0  ;;  %v1738_v30 = vpop.eup %1737  ;;  %vm1004_vm5 = vcmp.eq.s32.totalorder %v2427_v34, %v2243_v9 }
 0x172   : > { %1749 = vpow2.f32 %v1152_v3  ;;  %v944_v50 = vadd.f32 %v942_v35, %v912_v39  ;;  %v1182_v12 = vmul.f32 1.442695, %v1180_v45  ;;  %v1212_v61 = vmin.f32 %v1210_v38, 0.0  ;;  %v2541_v23 = vpop.eup %1739 }
 0x173   : > { %vm1101_vm6 = vcmp.eq.s32.totalorder %v2518_v21, %v2245_v10  ;;  %vm1132_vm7 = vcmp.eq.s32.totalorder %v2539_v62, %v2243_v9  ;;  %v934_v44 = vadd.f32 %v932_v58, %v902_v18  ;;  %v931_v48 = vadd.f32 %v1738_v30, %v899_v16  ;;  %v2597_v58 = vpop.permute.xlu0 %1226 }
 0x174   : > { %v933_v55 = vmul.f32 %v1738_v30, %v1738_v30  ;;  %v943_v33 = vsel %vm941_vm0, %v1738_v30, 0.0  ;;  %v2552_v39 = vmul.f32 %v2490_v25, %v2490_v25  ;;  %v2558_v15 = vsel %vm1069_vm1, %v2490_v25, 0.0  ;;  %v1742_v53 = vpop.eup %1741  ;;  %v2577_v45 = vpop.permute.xlu1 %1194 }
 0x175   : > { %v945_v20 = vadd.f32 %v943_v33, %v913_v28  ;;  %1751 = vpow2.f32 %v992_v32  ;;  %vm1133_vm8 = vcmp.eq.s32.totalorder %v2539_v62, %v2245_v10  ;;  %v1184_v13 = vmul.f32 1.442695, %v1181_v36  ;;  %v2562_v6 = vpop.eup %1743 }
 0x176   : > { %v935_v18 = vadd.f32 %v933_v55, %v903_v54  ;;  %v1213_v29 = vmin.f32 %v1211_v8, 0.0  ;;  %v1244_v52 = vmin.f32 %v1242_v5, 0.0  ;;  %v962_v49 = vadd.f32 %v1742_v53, %v930_v41 }
 0x177   : > { %v964_v2 = vmul.f32 %v1742_v53, %v1742_v53  ;;  %v974_v51 = vsel %vm972_vm2, %v1742_v53, 0.0  ;;  %v1243_v11 = vadd.f32 %v2440_v1, %v2409_v47  ;;  %v1746_v46 = vpop.eup %1745  ;;  %vm1005_vm9 = vcmp.eq.s32.totalorder %v2427_v34, %v2245_v10 }
 0x178   : > { %vm1164_vm10 = vcmp.eq.s32.totalorder %v2564_v26, %v2243_v9  ;;  %v1092_v59 = vmul.f32 %v2497_v60, %v2497_v60  ;;  %1753 = vpow2.f32 %v1182_v12  ;;  %v976_v3 = vadd.f32 %v974_v51, %v944_v50  ;;  %v2614_v55 = vpop.permute.xlu1 %1258 }
 0x179   : > { %v1214_v27 = vmul.f32 1.442695, %v1212_v61  ;;  %v966_v36 = vadd.f32 %v964_v2, %v934_v44  ;;  %v963_v38 = vadd.f32 %v1746_v46, %v931_v48  ;;  %v965_v0 = vmul.f32 %v1746_v46, %v1746_v46 }
 0x17a   : > { %v975_v47 = vsel %vm973_vm3, %v1746_v46, 0.0  ;;  %v1102_v1 = vsel %vm1100_vm4, %v2497_v60, 0.0  ;;  %1755 = vpow2.f32 %v1184_v13  ;;  %v1246_v17 = vmul.f32 1.442695, %v1244_v52  ;;  %v1748_v4 = vpop.eup %1747 }
 0x17b   : > { %v977_v16 = vadd.f32 %v975_v47, %v945_v20  ;;  %v2588_v8 = vmul.f32 %v2514_v7, %v2514_v7  ;;  %v967_v57 = vadd.f32 %v965_v0, %v935_v18  ;;  %v1216_v28 = vmul.f32 1.442695, %v1213_v29 }
 0x17c   : > { %v1245_v5 = vmin.f32 %v1243_v11, 0.0  ;;  %vm1165_vm11 = vcmp.eq.s32.totalorder %v2564_v26, %v2245_v10  ;;  %1757 = vpow2.f32 %v1214_v27  ;;  %v994_v63 = vadd.f32 %v1748_v4, %v962_v49  ;;  %v2595_v41 = vpop.eup %1749 }
 0x17d   : > { %v996_v32 = vmul.f32 %v1748_v4, %v1748_v4  ;;  %v1006_v54 = vsel %vm1004_vm5, %v1748_v4, 0.0  ;;  %v1103_v35 = vsel %vm1101_vm6, %v2514_v7, 0.0  ;;  %v1124_v30 = vmul.f32 %v2531_v43, %v2531_v43 }
 0x17e   : > { %v1134_v50 = vsel %vm1132_vm7, %v2531_v43, 0.0  ;;  %v1008_v12 = vadd.f32 %v1006_v54, %v976_v3  ;;  %vm1196_vm12 = vcmp.eq.s32.totalorder %v2577_v45, %v2243_v9  ;;  %v1125_v61 = vmul.f32 %v2541_v23, %v2541_v23 }
 0x17f   : > { %v998_v44 = vadd.f32 %v996_v32, %v966_v36  ;;  %v1026_v48 = vadd.f32 %v2402_v14, %v994_v63  ;;  %1759 = vpow2.f32 %v1246_v17  ;;  %v1752_v21 = vpop.eup %1751  ;;  %v1135_v33 = vsel %vm1133_vm8, %v2541_v23, 0.0 }
 0x180   : > { %1761 = vpow2.f32 %v1216_v28  ;;  %v1040_v20 = vadd.f32 %v2484_v31, %v1008_v12  ;;  %v1248_v53 = vmul.f32 1.442695, %v1245_v5  ;;  %vm1228_vm13 = vcmp.eq.s32.totalorder %v2597_v58, %v2243_v9 }
 0x181   : > { %v1030_v18 = vadd.f32 %v2479_v40, %v998_v44  ;;  %v1058_v14 = vadd.f32 %v2459_v56, %v1026_v48  ;;  %v995_v13 = vadd.f32 %v1752_v21, %v963_v38  ;;  %v997_v29 = vmul.f32 %v1752_v21, %v1752_v21 }
 0x182   : > { %v1156_v52 = vmul.f32 %v2562_v6, %v2562_v6  ;;  %v1166_v62 = vsel %vm1164_vm10, %v2562_v6, 0.0  ;;  %v1072_v31 = vadd.f32 %v2509_v22, %v1040_v20  ;;  %v1007_v49 = vsel %vm1005_vm9, %v1752_v21, 0.0  ;;  %v1754_v2 = vpop.eup %1753 }
 0x183   : > { %vm1260_vm14 = vcmp.eq.s32.totalorder %v2614_v55, %v2243_v9  ;;  %v1062_v56 = vadd.f32 %v2503_v24, %v1030_v18  ;;  %v1090_v40 = vadd.f32 %v2497_v60, %v1058_v14  ;;  %v999_v51 = vadd.f32 %v997_v29, %v967_v57  ;;  %v1278_v18 = vld [vmem:[%s2007_s27 + $0x20] sm:$0xff] }
 0x184   : > { %v1009_v11 = vadd.f32 %v1007_v49, %v977_v16  ;;  %v1157_v46 = vmul.f32 %v2595_v41, %v2595_v41  ;;  %v1104_v3 = vadd.f32 %v1102_v1, %v1072_v31  ;;  %v1027_v22 = vadd.f32 %v2433_v37, %v995_v13  ;;  %v1756_v27 = vpop.eup %1755 }
 0x185   : > { %1763 = vpow2.f32 %v1248_v53  ;;  %vm1197_vm15 = vcmp.eq.s32.totalorder %v2577_v45, %v2245_v10  ;;  %v1094_v34 = vadd.f32 %v1092_v59, %v1062_v56  ;;  %v1122_v36 = vadd.f32 %v2531_v43, %v1090_v40 }
 0x186   : > { %v1031_v24 = vadd.f32 %v2488_v19, %v999_v51  ;;  %v1041_v60 = vadd.f32 %v2495_v42, %v1009_v11  ;;  %v1167_v38 = vsel %vm1165_vm11, %v2595_v41, 0.0  ;;  %v1188_v0 = vmul.f32 %v1754_v2, %v1754_v2  ;;  %v1758_v1 = vpop.eup %1757 }
 0x187   : > { %v1136_v47 = vadd.f32 %v1134_v50, %v1104_v3  ;;  %v1059_v37 = vadd.f32 %v2490_v25, %v1027_v22  ;;  %vm1229_vm0 = vcmp.eq.s32.totalorder %v2597_v58, %v2245_v10  ;;  %v1126_v59 = vadd.f32 %v1124_v30, %v1094_v34  ;;  %v1267_v3 = vld [vmem:[%s2007_s27 + $0x8] sm:$0xff]  ;;  %v1273_v58 = vld [vmem:[%s2007_s27 + $0x18] sm:$0xff] }
 0x188   : > { %v1154_v43 = vadd.f32 %v2562_v6, %v1122_v36  ;;  %v1063_v19 = vadd.f32 %v2552_v39, %v1031_v24  ;;  %v1073_v42 = vadd.f32 %v2558_v15, %v1041_v60  ;;  %v1198_v26 = vsel %vm1196_vm12, %v1754_v2, 0.0  ;;  %v1279_v22 = vld [vmem:[%s2007_s27 + $0x28] sm:$0xff] }
 0x189   : > { %v1189_v16 = vmul.f32 %v1756_v27, %v1756_v27  ;;  %v1168_v17 = vadd.f32 %v1166_v62, %v1136_v47  ;;  %v1091_v4 = vadd.f32 %v2514_v7, %v1059_v37  ;;  %v1760_v25 = vpop.eup %1759  ;;  %v1158_v57 = vadd.f32 %v1156_v52, %v1126_v59  ;;  %v1272_v52 = vld [vmem:[%s2007_s27 + $0x10] sm:$0xff] }
 0x18a   : > { %v1186_v28 = vadd.f32 %v1754_v2, %v1154_v43  ;;  %v1095_v5 = vadd.f32 %v2588_v8, %v1063_v19  ;;  %v1105_v63 = vadd.f32 %v1103_v35, %v1073_v42  ;;  %v1762_v6 = vpop.eup %1761  ;;  %v1220_v39 = vmul.f32 %v1758_v1, %v1758_v1  ;;  %v1266_v35 = vld [vmem:[%s2007_s27] sm:$0xff] }
 0x18b   : > { %v1230_v15 = vsel %vm1228_vm13, %v1758_v1, 0.0  ;;  %v1200_v32 = vadd.f32 %v1198_v26, %v1168_v17  ;;  %v1123_v54 = vadd.f32 %v2541_v23, %v1091_v4  ;;  %v1190_v30 = vadd.f32 %v1188_v0, %v1158_v57 }
 0x18c   : > { %v1218_v50 = vadd.f32 %v1758_v1, %v1186_v28  ;;  %v1127_v7 = vadd.f32 %v1125_v61, %v1095_v5  ;;  %v1137_v12 = vadd.f32 %v1135_v33, %v1105_v63  ;;  %v1252_v48 = vmul.f32 %v1760_v25, %v1760_v25 }
 0x18d   : > { %v1232_v44 = vadd.f32 %v1230_v15, %v1200_v32  ;;  %v1262_v8 = vsel %vm1260_vm14, %v1760_v25, 0.0  ;;  %v1155_v21 = vadd.f32 %v2595_v41, %v1123_v54  ;;  %v1222_v20 = vadd.f32 %v1220_v39, %v1190_v30 }
 0x18e   : > { %v1250_v53 = vadd.f32 %v1760_v25, %v1218_v50  ;;  %v1159_v14 = vadd.f32 %v1157_v46, %v1127_v7  ;;  %v1169_v23 = vadd.f32 %v1167_v38, %v1137_v12  ;;  %v1199_v61 = vsel %vm1197_vm15, %v1756_v27, 0.0 }
 0x18f   : > { %v1764_v13 = vpop.eup %1763  ;;  %v1221_v33 = vmul.f32 %v1762_v6, %v1762_v6  ;;  %v1264_v29 = vadd.f32 %v1262_v8, %v1232_v44  ;;  %v1187_v9 = vadd.f32 %v1756_v27, %v1155_v21  ;;  %v1254_v62 = vadd.f32 %v1252_v48, %v1222_v20 }
 0x190   : > { %v1268_v41 = vadd.f32 %v1266_v35, %v1250_v53  ;;  %v1191_v31 = vadd.f32 %v1189_v16, %v1159_v14  ;;  %v1201_v49 = vadd.f32 %v1199_v61, %v1169_v23  ;;  %vm1261_vm1 = vcmp.eq.s32.totalorder %v2614_v55, %v2245_v10 }
 0x191   : > { %v1231_v45 = vsel %vm1229_vm0, %v1762_v6, 0.0  ;;  %v1280_v2 = vadd.f32 %v1278_v18, %v1264_v29  ;;  %v1219_v56 = vadd.f32 %v1762_v6, %v1187_v9  ;;  %v1274_v40 = vadd.f32 %v1272_v52, %v1254_v62 }
 0x192   : > { %1270 = vst [vmem:[%s2007_s27] sm:$0xff] %v1268_v41  ;;  %v1223_v51 = vadd.f32 %v1221_v33, %v1191_v31  ;;  %v1233_v11 = vadd.f32 %v1231_v45, %v1201_v49  ;;  %v1253_v46 = vmul.f32 %v1764_v13, %v1764_v13  ;;  %v1263_v10 = vsel %vm1261_vm1, %v1764_v13, 0.0 }
 0x193   : > { %1282 = vst [vmem:[%s2007_s27 + $0x20] sm:$0xff] %v1280_v2  ;;  %v1251_v55 = vadd.f32 %v1764_v13, %v1219_v56  ;;  %1276 = vst [vmem:[%s2007_s27 + $0x10] sm:$0xff] %v1274_v40 }
 0x194   : > { %v1255_v27 = vadd.f32 %v1253_v46, %v1223_v51  ;;  %v1265_v34 = vadd.f32 %v1263_v10, %v1233_v11 }
 0x195   : > { %v1269_v36 = vadd.f32 %v1267_v3, %v1251_v55 }
 0x196   : > { %v1275_v24 = vadd.f32 %v1273_v58, %v1255_v27  ;;  %v1281_v60 = vadd.f32 %v1279_v22, %v1265_v34 }
 0x197   : > { %1271 = vst [vmem:[%s2007_s27 + $0x8] sm:$0xff] %v1269_v36 }
 0x198   : > { %1277 = vst [vmem:[%s2007_s27 + $0x18] sm:$0xff] %v1275_v24  ;;  %1283 = vst [vmem:[%s2007_s27 + $0x28] sm:$0xff] %v1281_v60 }
 0x199   : > { %1778 = shalt.err (!%p1775_p10)
}
 0x19a   : > { %s1779_s8 = scalar_lea.hbm %s2692_s18, 768  ;;  %s1783_s27 = scalar_lea.hbm %s2759_s6, 1536 }
 0x19b   : > { %p1780_p11 = scmp.ne.s32.totalorder %s2692_s18, %s1779_s8  ;;  %p1784_p0 = scmp.lt.u32.totalorder %s2692_s18, %s2759_s6 }
 0x19c   : > { %p1785_p1 = scmp.lt.u32.totalorder %s1783_s27, %s1779_s8  ;;  %p1787_p4 = scmp.lt.u32.totalorder %s1779_s8, %s2692_s18 }
 0x19d   : > { %p1781_p12 = pnand %p1780_p11, %p1951_p3 }
 0x19e   : > { %p1786_p2 = por %p1785_p1, %p1784_p0 }
 0x19f   : > { %p1782_p13 = pneg %p1781_p12 }
 0x1a0   : > { %p1788_p5 = por %p1787_p4, %p1786_p2 }
 0x1a2   : > { %p1789_p6 = pnand %p1788_p5, %p1782_p13 }
 0x1a4   : > { %1792 = shalt.err (!%p1789_p6)
}
 0x1a5   : > { %s1864_s7 = smov 256   ;;  %s1865_s13 = smov 512  }
 0x1a6   : > { %s1866_s0 = smov 16  }
 0x1a7   : > { %1623 = dma.vmem_to_hbm [thread:$0]  (%p1951_p3), %s2694_s14, 768, %s2692_s18, %s2701_s30, %s1864_s7, %s1865_s13, %s1866_s0  }
 0x1a8 PF: > { %p1629_p7 = scmp.ge.s32.totalorder %s1859_s28, 2  ;;  %s1313_s25 = sand.u32 1, %s1831_s21  }
 0x1a9   : > { %s1314_s16 = scalar_lea.sflag [#allocation3], %s1313_s25 }
 0x1aa   : > { %p1626_p8 = pnand %p1629_p7, %p1961_p9 }
 0x1ac   : > { %1826 = dma.done.wait (!%p1626_p8), %s1314_s16, 768  }
 0x1ad   : > { %1828 = vsyncadd (!%p1626_p8), %s1314_s16, 4294966528  ;;  %s19_s28 = sadd.s32 1, %s1859_s28   ;;  %s2776_s19 = sld [smem:[#allocation9_spill]] }
 0x1ae   : > { %p16_p10 = scmp.ge.s32.totalorder %s19_s28, 10   ;;  %s2777_s24 = sld [smem:[#allocation5_spill]] }
 0x1af   : > { %s2778_s25 = sld [smem:[#allocation6_spill]]  ;;  %s2779_s26 = sld [smem:[#allocation7_spill]] }
 0x1b0   : > { %s2780_s27 = sld [smem:[#allocation8_spill]]  ;;  %s2781_s21 = smov %s1835_s22 }
 0x1b1   : > { %s2782_s22 = smov %s1839_s23  ;;  %18 = sbr.rel (!%p16_p10) target bundleno = 7 (0x7), region = 98 }
 0x1b3   : > { %s2783_s23 = smov %s2776_s19 }
 0x1b8   :  { %1319 = vsyncpa [#allocation3], 1 }
 0x1b9   :  { %1321 = vsyncpa [#allocation3 + $0x1], 1 }

</bundles_post_ra>
